<compile_context>
chip_gen: v7x
topology: tpu7x:2x2x1
jax: 0.10.0
libtpu: 0.0.40
codegen_flags: <defaults>
</compile_context>

<pallas_src>
import functools

import jax
import jax.numpy as jnp
from jax.experimental import pallas as pl
from jax.experimental.pallas import tpu as pltpu


def _encoder_kernel(nhead, eps,
                    x_ref, wqkv_ref, bqkv_ref, wo_ref, bo_ref,
                    g1_ref, be1_ref, w1_ref, b1_ref, w2_ref, b2_ref,
                    g2_ref, be2_ref, o_ref):
    nb, L, E = x_ref.shape
    dh = E // nhead
    M = nb * L          # tokens in this block
    B = nb * nhead      # flattened (batch, head) dim for attention

    x = x_ref[...].astype(jnp.float32)                   # (nb, L, E)
    x2 = x.reshape(M, E)                                  # major-dim merge only

    # --- fused QKV projection: bf16 operands, f32 accumulation on the MXU ---
    qkv = jnp.dot(x2.astype(jnp.bfloat16), wqkv_ref[...],
                  preferred_element_type=jnp.float32) + bqkv_ref[...]   # (M, 3E)

    # One batched relayout to feature-major (nb, 3, H, dh, L); everything after
    # is a single batched contraction (no per-batch / per-head Python loops).
    qkv_bf = qkv.astype(jnp.bfloat16).reshape(nb, L, 3 * E)
    qkv_fm = jnp.swapaxes(qkv_bf, 1, 2).reshape(nb, 3, nhead, dh, L)

    q_dl = qkv_fm[:, 0].reshape(B, dh, L)                 # (B, dh, L) scale folded
    k_dl = qkv_fm[:, 1].reshape(B, dh, L)
    v_dl = qkv_fm[:, 2].reshape(B, dh, L)
    q_ld = jnp.swapaxes(q_dl, 1, 2)                       # (B, L, dh)

    # Scores for all (batch, head) pairs in one contraction; softmax in f32.
    s = jnp.einsum('bqd,bdk->bqk', q_ld, k_dl,
                   preferred_element_type=jnp.float32)    # (B, L, L)
    s = s - jnp.max(s, axis=-1, keepdims=True)
    p = jnp.exp(s)
    p = p * pl.reciprocal(jnp.sum(p, axis=-1, keepdims=True), approx=True)

    # Context for all (batch, head) pairs in one contraction.
    a = jnp.einsum('bqk,bdk->bqd', p.astype(jnp.bfloat16), v_dl,
                   preferred_element_type=jnp.float32)    # (B, L, dh)

    # Back to token-major (M, E): batched last-two-dim swaps + major reshapes.
    a_dl = jnp.swapaxes(a.astype(jnp.bfloat16), 1, 2)     # (B, dh, L)
    attn_tok = jnp.swapaxes(a_dl.reshape(nb, E, L), 1, 2).reshape(M, E)

    attn = jnp.dot(attn_tok, wo_ref[...],
                   preferred_element_type=jnp.float32) + bo_ref[...]

    def layer_norm(t, g, b):
        # Fused single pass: mean and mean-of-squares are independent reductions.
        mu = jnp.mean(t, axis=-1, keepdims=True)
        var = jnp.mean(t * t, axis=-1, keepdims=True) - mu * mu
        return (t - mu) * jax.lax.rsqrt(var + eps) * g + b

    # --- residual + LayerNorm1 (f32) ---
    y = layer_norm(x2 + attn, g1_ref[...], be1_ref[...])

    # --- FFN: linear1 -> relu -> linear2 ---
    hid = jnp.dot(y.astype(jnp.bfloat16), w1_ref[...],
                  preferred_element_type=jnp.float32) + b1_ref[...]
    hid = jnp.maximum(hid, 0.0)
    ff = jnp.dot(hid.astype(jnp.bfloat16), w2_ref[...],
                 preferred_element_type=jnp.float32) + b2_ref[...]

    # --- residual + LayerNorm2 (f32) ---
    z = layer_norm(y + ff, g2_ref[...], be2_ref[...])

    o_ref[...] = z.reshape(nb, L, E).astype(o_ref.dtype)


def prepack_params(params, nhead):
    """Pack / transpose / cast weights once (call outside the per-call path)."""
    E = params["out_w"].shape[0]
    F = params["w1"].shape[0]
    dh = E // nhead
    scale = 1.0 / float(dh) ** 0.5
    w = params["in_proj_w"]
    b = params["in_proj_b"]
    # Fold 1/sqrt(dh) into the query weights/bias; fuse q, k, v into one matmul.
    wqkv = jnp.concatenate([w[:E] * scale, w[E:2 * E], w[2 * E:]], axis=0)
    wqkv = wqkv.T.astype(jnp.bfloat16)                               # (E, 3E)
    bqkv = jnp.concatenate([b[:E] * scale, b[E:2 * E], b[2 * E:]])
    bqkv = bqkv.reshape(1, 3 * E).astype(jnp.float32)
    f32 = jnp.float32
    return (
        wqkv, bqkv,
        params["out_w"].T.astype(jnp.bfloat16), params["out_b"].reshape(1, E).astype(f32),
        params["g1"].reshape(1, E).astype(f32), params["be1"].reshape(1, E).astype(f32),
        params["w1"].T.astype(jnp.bfloat16), params["b1"].reshape(1, F).astype(f32),
        params["w2"].T.astype(jnp.bfloat16), params["b2"].reshape(1, E).astype(f32),
        params["g2"].reshape(1, E).astype(f32), params["be2"].reshape(1, E).astype(f32),
    )


def _vmem_capacity_bytes():
    try:
        return int(pltpu.get_tpu_info().vmem_capacity_bytes)
    except Exception:
        return 64 * 1024 * 1024   # conservative (v7x per-core) fallback


def _block_vmem_estimate(nb, L, E, F, nhead, weight_bytes):
    """Rough per-block VMEM footprint (conservative: weights double-buffered)."""
    M = nb * L
    B = nb * nhead
    dh = E // nhead
    io = 2 * (2 * M * E * 4)                        # double-buffered in + out blocks
    act_f32 = M * (3 * E + 6 * E + F) * 4           # qkv, attn, y, ff, z, x2, hid
    act_bf16 = M * (2 * 3 * E + 2 * E + F) * 2      # bf16 copies / relayout temps
    scores = B * L * L * (4 + 4 + 2)                # s, p (f32) + p (bf16)
    ctx = B * L * dh * (4 + 2 + 2)                  # a (f32) + bf16 relayouts
    return 2 * weight_bytes + io + act_f32 + act_bf16 + scores + ctx


def _pick_nb(N, L, E, F, nhead, weight_bytes, budget):
    divisors = [d for d in range(1, N + 1) if N % d == 0]
    fitting = [d for d in divisors
               if _block_vmem_estimate(d, L, E, F, nhead, weight_bytes) <= budget]
    if not fitting:
        fitting = [1]
    # Prefer >= 2 grid steps (pipelining + v7x megacore), then the largest nb.
    multi = [d for d in fitting if N // d >= 2]
    return max(multi) if multi else max(fitting)


def transformer_encoder_block(src, packed, nhead):
    """src: (L, N, E) float32, packed = prepack_params(...) -> (L, N, E) float32."""
    L, N, E = src.shape
    F = packed[6].shape[1]
    dh = E // nhead
    assert E % nhead == 0

    cap = _vmem_capacity_bytes()
    vmem_limit = int(cap * 0.8)                      # ~20% headroom for compiler scratch
    weight_bytes = sum(int(a.size) * a.dtype.itemsize for a in packed)
    nb = _pick_nb(N, L, E, F, nhead, weight_bytes, int(vmem_limit * 0.7))
    grid_steps = N // nb

    # One wrapper-side transpose to batch-major; blocks then flatten contiguously.
    x_nle = jnp.transpose(src, (1, 0, 2))            # (N, L, E)

    flops = 2 * N * L * E * (3 * E + E + 2 * F) + 4 * N * nhead * L * L * dh
    cost = pl.CostEstimate(
        flops=int(flops),
        transcendentals=int(N * nhead * L * L),
        bytes_accessed=int(2 * src.size * 4 + weight_bytes * grid_steps))

    def build(single_buffer_weights):
        def const_spec(a):
            kwargs = {}
            if single_buffer_weights:
                # Constant index_map -> second pipeline buffer is pure waste.
                kwargs["pipeline_mode"] = pl.Buffered(1)
            return pl.BlockSpec(a.shape, lambda n, _nd=a.ndim: (0,) * _nd, **kwargs)

        in_specs = [pl.BlockSpec((nb, L, E), lambda n: (n, 0, 0))]
        in_specs += [const_spec(a) for a in packed]
        return pl.pallas_call(
            functools.partial(_encoder_kernel, nhead, 1e-5),
            out_shape=jax.ShapeDtypeStruct((N, L, E), src.dtype),
            grid=(grid_steps,),
            in_specs=in_specs,
            out_specs=pl.BlockSpec((nb, L, E), lambda n: (n, 0, 0)),
            compiler_params=pltpu.CompilerParams(
                dimension_semantics=("parallel",),
                vmem_limit_bytes=vmem_limit),
            cost_estimate=cost,
        )

    try:
        out_nle = build(True)(x_nle, *packed)
    except Exception:
        # Fallback if single-buffered (Buffered(1)) weight specs are unsupported.
        out_nle = build(False)(x_nle, *packed)

    return jnp.transpose(out_nle, (1, 0, 2))         # back to (L, N, E)


def reference(src, params, nhead):
    """Pure-JAX f32 reference mirroring the PyTorch block (eval mode)."""
    L, N, E = src.shape
    dh = E // nhead
    x = jnp.transpose(src, (1, 0, 2))                 # (N, L, E)
    wq, wk, wv = (params["in_proj_w"][:E], params["in_proj_w"][E:2 * E],
                  params["in_proj_w"][2 * E:])
    bq, bk, bv = (params["in_proj_b"][:E], params["in_proj_b"][E:2 * E],
                  params["in_proj_b"][2 * E:])
    q = x @ wq.T + bq
    k = x @ wk.T + bk
    v = x @ wv.T + bv
    qh = q.reshape(N, L, nhead, dh).transpose(0, 2, 1, 3)
    kh = k.reshape(N, L, nhead, dh).transpose(0, 2, 1, 3)
    vh = v.reshape(N, L, nhead, dh).transpose(0, 2, 1, 3)
    s = (qh / jnp.sqrt(dh).astype(jnp.float32)) @ kh.transpose(0, 1, 3, 2)
    p = jax.nn.softmax(s, axis=-1)
    a = (p @ vh).transpose(0, 2, 1, 3).reshape(N, L, E)
    attn = a @ params["out_w"].T + params["out_b"]

    def ln(t, g, b):
        mu = jnp.mean(t, axis=-1, keepdims=True)
        var = jnp.mean((t - mu) ** 2, axis=-1, keepdims=True)
        return (t - mu) * jax.lax.rsqrt(var + 1e-5) * g + b

    y = ln(x + attn, params["g1"], params["be1"])
    ff = jnp.maximum(y @ params["w1"].T + params["b1"], 0.0) @ params["w2"].T + params["b2"]
    z = ln(y + ff, params["g2"], params["be2"])
    return jnp.transpose(z, (1, 0, 2))


def make_params(key, d_model, dim_feedforward):
    ks = jax.random.split(key, 8)

    def init(k, shape, scale=0.08):
        return jax.random.normal(k, shape, dtype=jnp.float32) * scale

    return {
        "in_proj_w": init(ks[0], (3 * d_model, d_model)),
        "in_proj_b": init(ks[1], (3 * d_model,)),
        "out_w": init(ks[2], (d_model, d_model)),
        "out_b": init(ks[3], (d_model,)),
        "w1": init(ks[4], (dim_feedforward, d_model)),
        "b1": init(ks[5], (dim_feedforward,)),
        "w2": init(ks[6], (d_model, dim_feedforward)),
        "b2": init(ks[7], (d_model,)),
        "g1": jnp.ones((d_model,), jnp.float32),
        "be1": jnp.zeros((d_model,), jnp.float32),
        "g2": jnp.ones((d_model,), jnp.float32),
        "be2": jnp.zeros((d_model,), jnp.float32),
    }


if __name__ == "__main__":
    L, N, E = 8, 2, 32            # seq len, batch, d_model
    NHEAD = 4
    FF = 64                       # dim_feedforward

    key = jax.random.PRNGKey(0)
    k_x, k_p = jax.random.split(key)
    src = jax.random.normal(k_x, (L, N, E), dtype=jnp.float32)
    params = make_params(k_p, E, FF)
    packed = prepack_params(params, NHEAD)       # pre-pack weights once

    out = transformer_encoder_block(src, packed, NHEAD)
    out = jax.block_until_ready(out)

    ref = jax.block_until_ready(reference(src, params, NHEAD))
    assert out.shape == (L, N, E)
    # bf16 matmuls + approx reciprocal -> compare against f32 reference loosely.
    err = float(jnp.max(jnp.abs(out - ref)))
    assert jnp.allclose(out, ref, atol=2e-2, rtol=2e-2), err

    print("KERNEL_OK")
</pallas_src>

<mosaic_0001>
module attributes {stable_mosaic.version = 11 : i64} {
  func.func @_encoder_kernel(%arg0: i32, %arg1: memref<1x8x32xf32, #tpu.memory_space<vmem>>, %arg2: memref<32x96xbf16, #tpu.memory_space<vmem>>, %arg3: memref<1x96xf32, #tpu.memory_space<vmem>>, %arg4: memref<32x32xbf16, #tpu.memory_space<vmem>>, %arg5: memref<1x32xf32, #tpu.memory_space<vmem>>, %arg6: memref<1x32xf32, #tpu.memory_space<vmem>>, %arg7: memref<1x32xf32, #tpu.memory_space<vmem>>, %arg8: memref<32x64xbf16, #tpu.memory_space<vmem>>, %arg9: memref<1x64xf32, #tpu.memory_space<vmem>>, %arg10: memref<64x32xbf16, #tpu.memory_space<vmem>>, %arg11: memref<1x32xf32, #tpu.memory_space<vmem>>, %arg12: memref<1x32xf32, #tpu.memory_space<vmem>>, %arg13: memref<1x32xf32, #tpu.memory_space<vmem>>, %arg14: memref<1x8x32xf32, #tpu.memory_space<vmem>>) attributes {dimension_semantics = [#tpu.dimension_semantics<parallel>], iteration_bounds = array<i64: 2>, scalar_prefetch = 0 : i64, scratch_operands = 0 : i64, tpu.core_type = #tpu.core_type<tc>, window_params = [{transform_indices = @transform_0, window_bounds = array<i64: 1, 8, 32>}, {pipeline_mode = #tpu.pipeline_mode<synchronous>, transform_indices = @transform_1, window_bounds = array<i64: 32, 96>}, {pipeline_mode = #tpu.pipeline_mode<synchronous>, transform_indices = @transform_2, window_bounds = array<i64: 1, 96>}, {pipeline_mode = #tpu.pipeline_mode<synchronous>, transform_indices = @transform_3, window_bounds = array<i64: 32, 32>}, {pipeline_mode = #tpu.pipeline_mode<synchronous>, transform_indices = @transform_4, window_bounds = array<i64: 1, 32>}, {pipeline_mode = #tpu.pipeline_mode<synchronous>, transform_indices = @transform_5, window_bounds = array<i64: 1, 32>}, {pipeline_mode = #tpu.pipeline_mode<synchronous>, transform_indices = @transform_6, window_bounds = array<i64: 1, 32>}, {pipeline_mode = #tpu.pipeline_mode<synchronous>, transform_indices = @transform_7, window_bounds = array<i64: 32, 64>}, {pipeline_mode = #tpu.pipeline_mode<synchronous>, transform_indices = @transform_8, window_bounds = array<i64: 1, 64>}, {pipeline_mode = #tpu.pipeline_mode<synchronous>, transform_indices = @transform_9, window_bounds = array<i64: 64, 32>}, {pipeline_mode = #tpu.pipeline_mode<synchronous>, transform_indices = @transform_10, window_bounds = array<i64: 1, 32>}, {pipeline_mode = #tpu.pipeline_mode<synchronous>, transform_indices = @transform_11, window_bounds = array<i64: 1, 32>}, {pipeline_mode = #tpu.pipeline_mode<synchronous>, transform_indices = @transform_12, window_bounds = array<i64: 1, 32>}, {transform_indices = @transform_13, window_bounds = array<i64: 1, 8, 32>}]} {
    %c0 = arith.constant 0 : index
    %c0_0 = arith.constant 0 : index
    %c0_1 = arith.constant 0 : index
    %0 = vector.load %arg1[%c0, %c0_0, %c0_1] : memref<1x8x32xf32, #tpu.memory_space<vmem>>, vector<1x8x32xf32>
    %1 = vector.shape_cast %0 : vector<1x8x32xf32> to vector<8x32xf32>
    %2 = arith.truncf %1 : vector<8x32xf32> to vector<8x32xbf16>
    %c0_2 = arith.constant 0 : index
    %c0_3 = arith.constant 0 : index
    %3 = vector.load %arg2[%c0_2, %c0_3] : memref<32x96xbf16, #tpu.memory_space<vmem>>, vector<32x96xbf16>
    %cst = arith.constant dense<0.000000e+00> : vector<8x96xf32>
    %4 = tpu.matmul %2, %3, %cst {dimension_numbers = #tpu.dot_dimension_numbers<[1], [0], [0], [1], [0, 0, 1, 1], [], []>} : vector<8x32xbf16>, vector<32x96xbf16>, vector<8x96xf32> -> vector<8x96xf32>
    %c0_4 = arith.constant 0 : index
    %c0_5 = arith.constant 0 : index
    %5 = vector.load %arg3[%c0_4, %c0_5] : memref<1x96xf32, #tpu.memory_space<vmem>>, vector<1x96xf32>
    %6 = vector.broadcast %5 : vector<1x96xf32> to vector<8x96xf32>
    %7 = arith.addf %4, %6 : vector<8x96xf32>
    %8 = arith.truncf %7 : vector<8x96xf32> to vector<8x96xbf16>
    %9 = vector.shape_cast %8 : vector<8x96xbf16> to vector<1x8x96xbf16>
    %10 = tpu.transpose %9, [0, 2, 1] : vector<1x8x96xbf16> -> vector<1x96x8xbf16>
    %11 = vector.shape_cast %10 : vector<1x96x8xbf16> to vector<1x3x4x8x8xbf16>
    %12 = vector.extract_strided_slice %11 {offsets = [0, 0, 0, 0, 0], sizes = [1, 1, 4, 8, 8], strides = [1, 1, 1, 1, 1]} : vector<1x3x4x8x8xbf16> to vector<1x1x4x8x8xbf16>
    %13 = vector.shape_cast %12 : vector<1x1x4x8x8xbf16> to vector<1x4x8x8xbf16>
    %14 = vector.shape_cast %13 : vector<1x4x8x8xbf16> to vector<4x8x8xbf16>
    %15 = vector.extract_strided_slice %11 {offsets = [0, 1, 0, 0, 0], sizes = [1, 1, 4, 8, 8], strides = [1, 1, 1, 1, 1]} : vector<1x3x4x8x8xbf16> to vector<1x1x4x8x8xbf16>
    %16 = vector.shape_cast %15 : vector<1x1x4x8x8xbf16> to vector<1x4x8x8xbf16>
    %17 = vector.shape_cast %16 : vector<1x4x8x8xbf16> to vector<4x8x8xbf16>
    %18 = vector.extract_strided_slice %11 {offsets = [0, 2, 0, 0, 0], sizes = [1, 1, 4, 8, 8], strides = [1, 1, 1, 1, 1]} : vector<1x3x4x8x8xbf16> to vector<1x1x4x8x8xbf16>
    %19 = vector.shape_cast %18 : vector<1x1x4x8x8xbf16> to vector<1x4x8x8xbf16>
    %20 = vector.shape_cast %19 : vector<1x4x8x8xbf16> to vector<4x8x8xbf16>
    %21 = tpu.transpose %14, [0, 2, 1] : vector<4x8x8xbf16> -> vector<4x8x8xbf16>
    "tpu.trace_start"() <{level = 10 : i32, message = "bqd,bdk->bqk"}> : () -> ()
    %cst_6 = arith.constant dense<0.000000e+00> : vector<4x8x8xf32>
    %22 = tpu.matmul %21, %17, %cst_6 {dimension_numbers = #tpu.dot_dimension_numbers<[2], [1], [1], [2], [0, 0, 0, 1, 1, 2], [0], [0]>} : vector<4x8x8xbf16>, vector<4x8x8xbf16>, vector<4x8x8xf32> -> vector<4x8x8xf32>
    "tpu.trace_stop"() : () -> ()
    %cst_7 = arith.constant dense<0xFF800000> : vector<4x8xf32>
    %23 = vector.multi_reduction <maximumf>, %22, %cst_7 [2] : vector<4x8x8xf32> to vector<4x8xf32>
    %24 = vector.shape_cast %23 : vector<4x8xf32> to vector<4x8x1xf32>
    %25 = vector.broadcast %24 : vector<4x8x1xf32> to vector<4x8x8xf32>
    %26 = arith.subf %22, %25 : vector<4x8x8xf32>
    %27 = math.exp %26 : vector<4x8x8xf32>
    %cst_8 = arith.constant dense<0.000000e+00> : vector<4x8xf32>
    %28 = vector.multi_reduction <add>, %27, %cst_8 [2] : vector<4x8x8xf32> to vector<4x8xf32>
    %29 = vector.shape_cast %28 : vector<4x8xf32> to vector<4x8x1xf32>
    %30 = tpu.reciprocal %29 {approx = true} : vector<4x8x1xf32> -> vector<4x8x1xf32>
    %31 = vector.broadcast %30 : vector<4x8x1xf32> to vector<4x8x8xf32>
    %32 = arith.mulf %27, %31 : vector<4x8x8xf32>
    %33 = arith.truncf %32 : vector<4x8x8xf32> to vector<4x8x8xbf16>
    "tpu.trace_start"() <{level = 10 : i32, message = "bqk,bdk->bqd"}> : () -> ()
    %cst_9 = arith.constant dense<0.000000e+00> : vector<4x8x8xf32>
    %34 = tpu.matmul %33, %20, %cst_9 {dimension_numbers = #tpu.dot_dimension_numbers<[2], [2], [1], [1], [0, 0, 0, 1, 1, 1], [0], [0]>} : vector<4x8x8xbf16>, vector<4x8x8xbf16>, vector<4x8x8xf32> -> vector<4x8x8xf32>
    "tpu.trace_stop"() : () -> ()
    %35 = arith.truncf %34 : vector<4x8x8xf32> to vector<4x8x8xbf16>
    %36 = tpu.transpose %35, [0, 2, 1] : vector<4x8x8xbf16> -> vector<4x8x8xbf16>
    %37 = vector.shape_cast %36 : vector<4x8x8xbf16> to vector<1x32x8xbf16>
    %38 = tpu.transpose %37, [0, 2, 1] : vector<1x32x8xbf16> -> vector<1x8x32xbf16>
    %39 = vector.shape_cast %38 : vector<1x8x32xbf16> to vector<8x32xbf16>
    %c0_10 = arith.constant 0 : index
    %c0_11 = arith.constant 0 : index
    %40 = vector.load %arg4[%c0_10, %c0_11] : memref<32x32xbf16, #tpu.memory_space<vmem>>, vector<32x32xbf16>
    %cst_12 = arith.constant dense<0.000000e+00> : vector<8x32xf32>
    %41 = tpu.matmul %39, %40, %cst_12 {dimension_numbers = #tpu.dot_dimension_numbers<[1], [0], [0], [1], [0, 0, 1, 1], [], []>} : vector<8x32xbf16>, vector<32x32xbf16>, vector<8x32xf32> -> vector<8x32xf32>
    %c0_13 = arith.constant 0 : index
    %c0_14 = arith.constant 0 : index
    %42 = vector.load %arg5[%c0_13, %c0_14] : memref<1x32xf32, #tpu.memory_space<vmem>>, vector<1x32xf32>
    %43 = vector.broadcast %42 : vector<1x32xf32> to vector<8x32xf32>
    %44 = arith.addf %41, %43 : vector<8x32xf32>
    %45 = arith.addf %1, %44 : vector<8x32xf32>
    %c0_15 = arith.constant 0 : index
    %c0_16 = arith.constant 0 : index
    %46 = vector.load %arg6[%c0_15, %c0_16] : memref<1x32xf32, #tpu.memory_space<vmem>>, vector<1x32xf32>
    %c0_17 = arith.constant 0 : index
    %c0_18 = arith.constant 0 : index
    %47 = vector.load %arg7[%c0_17, %c0_18] : memref<1x32xf32, #tpu.memory_space<vmem>>, vector<1x32xf32>
    %cst_19 = arith.constant dense<0.000000e+00> : vector<8xf32>
    %48 = vector.multi_reduction <add>, %45, %cst_19 [1] : vector<8x32xf32> to vector<8xf32>
    %49 = vector.shape_cast %48 : vector<8xf32> to vector<8x1xf32>
    %cst_20 = arith.constant 3.200000e+01 : f32
    %50 = vector.broadcast %cst_20 : f32 to vector<8x1xf32>
    %51 = arith.divf %49, %50 : vector<8x1xf32>
    %52 = arith.mulf %45, %45 : vector<8x32xf32>
    %cst_21 = arith.constant dense<0.000000e+00> : vector<8xf32>
    %53 = vector.multi_reduction <add>, %52, %cst_21 [1] : vector<8x32xf32> to vector<8xf32>
    %54 = vector.shape_cast %53 : vector<8xf32> to vector<8x1xf32>
    %cst_22 = arith.constant 3.200000e+01 : f32
    %55 = vector.broadcast %cst_22 : f32 to vector<8x1xf32>
    %56 = arith.divf %54, %55 : vector<8x1xf32>
    %57 = arith.mulf %51, %51 : vector<8x1xf32>
    %58 = arith.subf %56, %57 : vector<8x1xf32>
    %59 = vector.broadcast %51 : vector<8x1xf32> to vector<8x32xf32>
    %60 = arith.subf %45, %59 : vector<8x32xf32>
    %cst_23 = arith.constant 9.99999974E-6 : f32
    %61 = vector.broadcast %cst_23 : f32 to vector<8x1xf32>
    %62 = arith.addf %58, %61 : vector<8x1xf32>
    %63 = math.rsqrt %62 : vector<8x1xf32>
    %64 = vector.broadcast %63 : vector<8x1xf32> to vector<8x32xf32>
    %65 = arith.mulf %60, %64 : vector<8x32xf32>
    %66 = vector.broadcast %46 : vector<1x32xf32> to vector<8x32xf32>
    %67 = arith.mulf %65, %66 : vector<8x32xf32>
    %68 = vector.broadcast %47 : vector<1x32xf32> to vector<8x32xf32>
    %69 = arith.addf %67, %68 : vector<8x32xf32>
    %70 = arith.truncf %69 : vector<8x32xf32> to vector<8x32xbf16>
    %c0_24 = arith.constant 0 : index
    %c0_25 = arith.constant 0 : index
    %71 = vector.load %arg8[%c0_24, %c0_25] : memref<32x64xbf16, #tpu.memory_space<vmem>>, vector<32x64xbf16>
    %cst_26 = arith.constant dense<0.000000e+00> : vector<8x64xf32>
    %72 = tpu.matmul %70, %71, %cst_26 {dimension_numbers = #tpu.dot_dimension_numbers<[1], [0], [0], [1], [0, 0, 1, 1], [], []>} : vector<8x32xbf16>, vector<32x64xbf16>, vector<8x64xf32> -> vector<8x64xf32>
    %c0_27 = arith.constant 0 : index
    %c0_28 = arith.constant 0 : index
    %73 = vector.load %arg9[%c0_27, %c0_28] : memref<1x64xf32, #tpu.memory_space<vmem>>, vector<1x64xf32>
    %74 = vector.broadcast %73 : vector<1x64xf32> to vector<8x64xf32>
    %75 = arith.addf %72, %74 : vector<8x64xf32>
    %cst_29 = arith.constant 0.000000e+00 : f32
    %76 = vector.broadcast %cst_29 : f32 to vector<8x64xf32>
    %77 = arith.maximumf %75, %76 : vector<8x64xf32>
    %78 = arith.truncf %77 : vector<8x64xf32> to vector<8x64xbf16>
    %c0_30 = arith.constant 0 : index
    %c0_31 = arith.constant 0 : index
    %79 = vector.load %arg10[%c0_30, %c0_31] : memref<64x32xbf16, #tpu.memory_space<vmem>>, vector<64x32xbf16>
    %cst_32 = arith.constant dense<0.000000e+00> : vector<8x32xf32>
    %80 = tpu.matmul %78, %79, %cst_32 {dimension_numbers = #tpu.dot_dimension_numbers<[1], [0], [0], [1], [0, 0, 1, 1], [], []>} : vector<8x64xbf16>, vector<64x32xbf16>, vector<8x32xf32> -> vector<8x32xf32>
    %c0_33 = arith.constant 0 : index
    %c0_34 = arith.constant 0 : index
    %81 = vector.load %arg11[%c0_33, %c0_34] : memref<1x32xf32, #tpu.memory_space<vmem>>, vector<1x32xf32>
    %82 = vector.broadcast %81 : vector<1x32xf32> to vector<8x32xf32>
    %83 = arith.addf %80, %82 : vector<8x32xf32>
    %84 = arith.addf %69, %83 : vector<8x32xf32>
    %c0_35 = arith.constant 0 : index
    %c0_36 = arith.constant 0 : index
    %85 = vector.load %arg12[%c0_35, %c0_36] : memref<1x32xf32, #tpu.memory_space<vmem>>, vector<1x32xf32>
    %c0_37 = arith.constant 0 : index
    %c0_38 = arith.constant 0 : index
    %86 = vector.load %arg13[%c0_37, %c0_38] : memref<1x32xf32, #tpu.memory_space<vmem>>, vector<1x32xf32>
    %cst_39 = arith.constant dense<0.000000e+00> : vector<8xf32>
    %87 = vector.multi_reduction <add>, %84, %cst_39 [1] : vector<8x32xf32> to vector<8xf32>
    %88 = vector.shape_cast %87 : vector<8xf32> to vector<8x1xf32>
    %cst_40 = arith.constant 3.200000e+01 : f32
    %89 = vector.broadcast %cst_40 : f32 to vector<8x1xf32>
    %90 = arith.divf %88, %89 : vector<8x1xf32>
    %91 = arith.mulf %84, %84 : vector<8x32xf32>
    %cst_41 = arith.constant dense<0.000000e+00> : vector<8xf32>
    %92 = vector.multi_reduction <add>, %91, %cst_41 [1] : vector<8x32xf32> to vector<8xf32>
    %93 = vector.shape_cast %92 : vector<8xf32> to vector<8x1xf32>
    %cst_42 = arith.constant 3.200000e+01 : f32
    %94 = vector.broadcast %cst_42 : f32 to vector<8x1xf32>
    %95 = arith.divf %93, %94 : vector<8x1xf32>
    %96 = arith.mulf %90, %90 : vector<8x1xf32>
    %97 = arith.subf %95, %96 : vector<8x1xf32>
    %98 = vector.broadcast %90 : vector<8x1xf32> to vector<8x32xf32>
    %99 = arith.subf %84, %98 : vector<8x32xf32>
    %cst_43 = arith.constant 9.99999974E-6 : f32
    %100 = vector.broadcast %cst_43 : f32 to vector<8x1xf32>
    %101 = arith.addf %97, %100 : vector<8x1xf32>
    %102 = math.rsqrt %101 : vector<8x1xf32>
    %103 = vector.broadcast %102 : vector<8x1xf32> to vector<8x32xf32>
    %104 = arith.mulf %99, %103 : vector<8x32xf32>
    %105 = vector.broadcast %85 : vector<1x32xf32> to vector<8x32xf32>
    %106 = arith.mulf %104, %105 : vector<8x32xf32>
    %107 = vector.broadcast %86 : vector<1x32xf32> to vector<8x32xf32>
    %108 = arith.addf %106, %107 : vector<8x32xf32>
    %109 = vector.shape_cast %108 : vector<8x32xf32> to vector<1x8x32xf32>
    %c0_44 = arith.constant 0 : index
    %c0_45 = arith.constant 0 : index
    %c0_46 = arith.constant 0 : index
    %110 = vector.load %arg14[%c0_44, %c0_45, %c0_46] : memref<1x8x32xf32, #tpu.memory_space<vmem>>, vector<1x8x32xf32>
    tpu.vector_store %arg14[%c0_44, %c0_45, %c0_46], %109 {strides = array<i32>} : memref<1x8x32xf32, #tpu.memory_space<vmem>>, vector<1x8x32xf32>,
    return
  }
  func.func @transform_0(%arg0: i32) -> (i32, i32, i32) {
    %c0_i32 = arith.constant 0 : i32
    %c0_i32_0 = arith.constant 0 : i32
    %c0_i32_1 = arith.constant 0 : i32
    return %arg0, %c0_i32, %c0_i32_0 : i32, i32, i32
  }
  func.func @transform_1(%arg0: i32) -> (i32, i32) {
    %c0_i32 = arith.constant 0 : i32
    %c0_i32_0 = arith.constant 0 : i32
    %c0_i32_1 = arith.constant 0 : i32
    return %c0_i32, %c0_i32_0 : i32, i32
  }
  func.func @transform_2(%arg0: i32) -> (i32, i32) {
    %c0_i32 = arith.constant 0 : i32
    %c0_i32_0 = arith.constant 0 : i32
    %c0_i32_1 = arith.constant 0 : i32
    return %c0_i32, %c0_i32_0 : i32, i32
  }
  func.func @transform_3(%arg0: i32) -> (i32, i32) {
    %c0_i32 = arith.constant 0 : i32
    %c0_i32_0 = arith.constant 0 : i32
    %c0_i32_1 = arith.constant 0 : i32
    return %c0_i32, %c0_i32_0 : i32, i32
  }
  func.func @transform_4(%arg0: i32) -> (i32, i32) {
    %c0_i32 = arith.constant 0 : i32
    %c0_i32_0 = arith.constant 0 : i32
    %c0_i32_1 = arith.constant 0 : i32
    return %c0_i32, %c0_i32_0 : i32, i32
  }
  func.func @transform_5(%arg0: i32) -> (i32, i32) {
    %c0_i32 = arith.constant 0 : i32
    %c0_i32_0 = arith.constant 0 : i32
    %c0_i32_1 = arith.constant 0 : i32
    return %c0_i32, %c0_i32_0 : i32, i32
  }
  func.func @transform_6(%arg0: i32) -> (i32, i32) {
    %c0_i32 = arith.constant 0 : i32
    %c0_i32_0 = arith.constant 0 : i32
    %c0_i32_1 = arith.constant 0 : i32
    return %c0_i32, %c0_i32_0 : i32, i32
  }
  func.func @transform_7(%arg0: i32) -> (i32, i32) {
    %c0_i32 = arith.constant 0 : i32
    %c0_i32_0 = arith.constant 0 : i32
    %c0_i32_1 = arith.constant 0 : i32
    return %c0_i32, %c0_i32_0 : i32, i32
  }
  func.func @transform_8(%arg0: i32) -> (i32, i32) {
    %c0_i32 = arith.constant 0 : i32
    %c0_i32_0 = arith.constant 0 : i32
    %c0_i32_1 = arith.constant 0 : i32
    return %c0_i32, %c0_i32_0 : i32, i32
  }
  func.func @transform_9(%arg0: i32) -> (i32, i32) {
    %c0_i32 = arith.constant 0 : i32
    %c0_i32_0 = arith.constant 0 : i32
    %c0_i32_1 = arith.constant 0 : i32
    return %c0_i32, %c0_i32_0 : i32, i32
  }
  func.func @transform_10(%arg0: i32) -> (i32, i32) {
    %c0_i32 = arith.constant 0 : i32
    %c0_i32_0 = arith.constant 0 : i32
    %c0_i32_1 = arith.constant 0 : i32
    return %c0_i32, %c0_i32_0 : i32, i32
  }
  func.func @transform_11(%arg0: i32) -> (i32, i32) {
    %c0_i32 = arith.constant 0 : i32
    %c0_i32_0 = arith.constant 0 : i32
    %c0_i32_1 = arith.constant 0 : i32
    return %c0_i32, %c0_i32_0 : i32, i32
  }
  func.func @transform_12(%arg0: i32) -> (i32, i32) {
    %c0_i32 = arith.constant 0 : i32
    %c0_i32_0 = arith.constant 0 : i32
    %c0_i32_1 = arith.constant 0 : i32
    return %c0_i32, %c0_i32_0 : i32, i32
  }
  func.func @transform_13(%arg0: i32) -> (i32, i32, i32) {
    %c0_i32 = arith.constant 0 : i32
    %c0_i32_0 = arith.constant 0 : i32
    %c0_i32_1 = arith.constant 0 : i32
    return %arg0, %c0_i32, %c0_i32_0 : i32, i32, i32
  }
}

module attributes {stable_mosaic.version = 11 : i64} {
  func.func @_encoder_kernel(%arg0: i32, %arg1: memref<1x8x32xf32, #tpu.memory_space<vmem>>, %arg2: memref<32x96xbf16, #tpu.memory_space<vmem>>, %arg3: memref<1x96xf32, #tpu.memory_space<vmem>>, %arg4: memref<32x32xbf16, #tpu.memory_space<vmem>>, %arg5: memref<1x32xf32, #tpu.memory_space<vmem>>, %arg6: memref<1x32xf32, #tpu.memory_space<vmem>>, %arg7: memref<1x32xf32, #tpu.memory_space<vmem>>, %arg8: memref<32x64xbf16, #tpu.memory_space<vmem>>, %arg9: memref<1x64xf32, #tpu.memory_space<vmem>>, %arg10: memref<64x32xbf16, #tpu.memory_space<vmem>>, %arg11: memref<1x32xf32, #tpu.memory_space<vmem>>, %arg12: memref<1x32xf32, #tpu.memory_space<vmem>>, %arg13: memref<1x32xf32, #tpu.memory_space<vmem>>, %arg14: memref<1x8x32xf32, #tpu.memory_space<vmem>>) attributes {dimension_semantics = [#tpu.dimension_semantics<parallel>], iteration_bounds = array<i64: 2>, scalar_prefetch = 0 : i64, scratch_operands = 0 : i64, tpu.core_type = #tpu.core_type<tc>, window_params = [{transform_indices = @transform_0, window_bounds = array<i64: 1, 8, 32>}, {pipeline_mode = #tpu.pipeline_mode<synchronous>, transform_indices = @transform_1, window_bounds = array<i64: 32, 96>}, {pipeline_mode = #tpu.pipeline_mode<synchronous>, transform_indices = @transform_2, window_bounds = array<i64: 1, 96>}, {pipeline_mode = #tpu.pipeline_mode<synchronous>, transform_indices = @transform_3, window_bounds = array<i64: 32, 32>}, {pipeline_mode = #tpu.pipeline_mode<synchronous>, transform_indices = @transform_4, window_bounds = array<i64: 1, 32>}, {pipeline_mode = #tpu.pipeline_mode<synchronous>, transform_indices = @transform_5, window_bounds = array<i64: 1, 32>}, {pipeline_mode = #tpu.pipeline_mode<synchronous>, transform_indices = @transform_6, window_bounds = array<i64: 1, 32>}, {pipeline_mode = #tpu.pipeline_mode<synchronous>, transform_indices = @transform_7, window_bounds = array<i64: 32, 64>}, {pipeline_mode = #tpu.pipeline_mode<synchronous>, transform_indices = @transform_8, window_bounds = array<i64: 1, 64>}, {pipeline_mode = #tpu.pipeline_mode<synchronous>, transform_indices = @transform_9, window_bounds = array<i64: 64, 32>}, {pipeline_mode = #tpu.pipeline_mode<synchronous>, transform_indices = @transform_10, window_bounds = array<i64: 1, 32>}, {pipeline_mode = #tpu.pipeline_mode<synchronous>, transform_indices = @transform_11, window_bounds = array<i64: 1, 32>}, {pipeline_mode = #tpu.pipeline_mode<synchronous>, transform_indices = @transform_12, window_bounds = array<i64: 1, 32>}, {transform_indices = @transform_13, window_bounds = array<i64: 1, 8, 32>}]} {
    %c0 = arith.constant 0 : index
    %c0_0 = arith.constant 0 : index
    %c0_1 = arith.constant 0 : index
    %0 = vector.load %arg1[%c0, %c0_0, %c0_1] : memref<1x8x32xf32, #tpu.memory_space<vmem>>, vector<1x8x32xf32>
    %1 = vector.shape_cast %0 : vector<1x8x32xf32> to vector<8x32xf32>
    %2 = arith.truncf %1 : vector<8x32xf32> to vector<8x32xbf16>
    %c0_2 = arith.constant 0 : index
    %c0_3 = arith.constant 0 : index
    %3 = vector.load %arg2[%c0_2, %c0_3] : memref<32x96xbf16, #tpu.memory_space<vmem>>, vector<32x96xbf16>
    %cst = arith.constant dense<0.000000e+00> : vector<8x96xf32>
    %4 = tpu.matmul %2, %3, %cst {dimension_numbers = #tpu.dot_dimension_numbers<[1], [0], [0], [1], [0, 0, 1, 1], [], []>} : vector<8x32xbf16>, vector<32x96xbf16>, vector<8x96xf32> -> vector<8x96xf32>
    %c0_4 = arith.constant 0 : index
    %c0_5 = arith.constant 0 : index
    %5 = vector.load %arg3[%c0_4, %c0_5] : memref<1x96xf32, #tpu.memory_space<vmem>>, vector<1x96xf32>
    %6 = vector.broadcast %5 : vector<1x96xf32> to vector<8x96xf32>
    %7 = arith.addf %4, %6 : vector<8x96xf32>
    %8 = arith.truncf %7 : vector<8x96xf32> to vector<8x96xbf16>
    %9 = vector.shape_cast %8 : vector<8x96xbf16> to vector<1x8x96xbf16>
    %10 = tpu.transpose %9, [0, 2, 1] : vector<1x8x96xbf16> -> vector<1x96x8xbf16>
    %11 = vector.shape_cast %10 : vector<1x96x8xbf16> to vector<1x3x4x8x8xbf16>
    %12 = vector.extract_strided_slice %11 {offsets = [0, 0, 0, 0, 0], sizes = [1, 1, 4, 8, 8], strides = [1, 1, 1, 1, 1]} : vector<1x3x4x8x8xbf16> to vector<1x1x4x8x8xbf16>
    %13 = vector.shape_cast %12 : vector<1x1x4x8x8xbf16> to vector<1x4x8x8xbf16>
    %14 = vector.shape_cast %13 : vector<1x4x8x8xbf16> to vector<4x8x8xbf16>
    %15 = vector.extract_strided_slice %11 {offsets = [0, 1, 0, 0, 0], sizes = [1, 1, 4, 8, 8], strides = [1, 1, 1, 1, 1]} : vector<1x3x4x8x8xbf16> to vector<1x1x4x8x8xbf16>
    %16 = vector.shape_cast %15 : vector<1x1x4x8x8xbf16> to vector<1x4x8x8xbf16>
    %17 = vector.shape_cast %16 : vector<1x4x8x8xbf16> to vector<4x8x8xbf16>
    %18 = vector.extract_strided_slice %11 {offsets = [0, 2, 0, 0, 0], sizes = [1, 1, 4, 8, 8], strides = [1, 1, 1, 1, 1]} : vector<1x3x4x8x8xbf16> to vector<1x1x4x8x8xbf16>
    %19 = vector.shape_cast %18 : vector<1x1x4x8x8xbf16> to vector<1x4x8x8xbf16>
    %20 = vector.shape_cast %19 : vector<1x4x8x8xbf16> to vector<4x8x8xbf16>
    %21 = tpu.transpose %14, [0, 2, 1] : vector<4x8x8xbf16> -> vector<4x8x8xbf16>
    "tpu.trace_start"() <{level = 10 : i32, message = "bqd,bdk->bqk"}> : () -> ()
    %cst_6 = arith.constant dense<0.000000e+00> : vector<4x8x8xf32>
    %22 = tpu.matmul %21, %17, %cst_6 {dimension_numbers = #tpu.dot_dimension_numbers<[2], [1], [1], [2], [0, 0, 0, 1, 1, 2], [0], [0]>} : vector<4x8x8xbf16>, vector<4x8x8xbf16>, vector<4x8x8xf32> -> vector<4x8x8xf32>
    "tpu.trace_stop"() : () -> ()
    %cst_7 = arith.constant dense<0xFF800000> : vector<4x8xf32>
    %23 = vector.multi_reduction <maximumf>, %22, %cst_7 [2] : vector<4x8x8xf32> to vector<4x8xf32>
    %24 = vector.shape_cast %23 : vector<4x8xf32> to vector<4x8x1xf32>
    %25 = vector.broadcast %24 : vector<4x8x1xf32> to vector<4x8x8xf32>
    %26 = arith.subf %22, %25 : vector<4x8x8xf32>
    %27 = math.exp %26 : vector<4x8x8xf32>
    %cst_8 = arith.constant dense<0.000000e+00> : vector<4x8xf32>
    %28 = vector.multi_reduction <add>, %27, %cst_8 [2] : vector<4x8x8xf32> to vector<4x8xf32>
    %29 = vector.shape_cast %28 : vector<4x8xf32> to vector<4x8x1xf32>
    %30 = tpu.reciprocal %29 {approx = true} : vector<4x8x1xf32> -> vector<4x8x1xf32>
    %31 = vector.broadcast %30 : vector<4x8x1xf32> to vector<4x8x8xf32>
    %32 = arith.mulf %27, %31 : vector<4x8x8xf32>
    %33 = arith.truncf %32 : vector<4x8x8xf32> to vector<4x8x8xbf16>
    "tpu.trace_start"() <{level = 10 : i32, message = "bqk,bdk->bqd"}> : () -> ()
    %cst_9 = arith.constant dense<0.000000e+00> : vector<4x8x8xf32>
    %34 = tpu.matmul %33, %20, %cst_9 {dimension_numbers = #tpu.dot_dimension_numbers<[2], [2], [1], [1], [0, 0, 0, 1, 1, 1], [0], [0]>} : vector<4x8x8xbf16>, vector<4x8x8xbf16>, vector<4x8x8xf32> -> vector<4x8x8xf32>
    "tpu.trace_stop"() : () -> ()
    %35 = arith.truncf %34 : vector<4x8x8xf32> to vector<4x8x8xbf16>
    %36 = tpu.transpose %35, [0, 2, 1] : vector<4x8x8xbf16> -> vector<4x8x8xbf16>
    %37 = vector.shape_cast %36 : vector<4x8x8xbf16> to vector<1x32x8xbf16>
    %38 = tpu.transpose %37, [0, 2, 1] : vector<1x32x8xbf16> -> vector<1x8x32xbf16>
    %39 = vector.shape_cast %38 : vector<1x8x32xbf16> to vector<8x32xbf16>
    %c0_10 = arith.constant 0 : index
    %c0_11 = arith.constant 0 : index
    %40 = vector.load %arg4[%c0_10, %c0_11] : memref<32x32xbf16, #tpu.memory_space<vmem>>, vector<32x32xbf16>
    %cst_12 = arith.constant dense<0.000000e+00> : vector<8x32xf32>
    %41 = tpu.matmul %39, %40, %cst_12 {dimension_numbers = #tpu.dot_dimension_numbers<[1], [0], [0], [1], [0, 0, 1, 1], [], []>} : vector<8x32xbf16>, vector<32x32xbf16>, vector<8x32xf32> -> vector<8x32xf32>
    %c0_13 = arith.constant 0 : index
    %c0_14 = arith.constant 0 : index
    %42 = vector.load %arg5[%c0_13, %c0_14] : memref<1x32xf32, #tpu.memory_space<vmem>>, vector<1x32xf32>
    %43 = vector.broadcast %42 : vector<1x32xf32> to vector<8x32xf32>
    %44 = arith.addf %41, %43 : vector<8x32xf32>
    %45 = arith.addf %1, %44 : vector<8x32xf32>
    %c0_15 = arith.constant 0 : index
    %c0_16 = arith.constant 0 : index
    %46 = vector.load %arg6[%c0_15, %c0_16] : memref<1x32xf32, #tpu.memory_space<vmem>>, vector<1x32xf32>
    %c0_17 = arith.constant 0 : index
    %c0_18 = arith.constant 0 : index
    %47 = vector.load %arg7[%c0_17, %c0_18] : memref<1x32xf32, #tpu.memory_space<vmem>>, vector<1x32xf32>
    %cst_19 = arith.constant dense<0.000000e+00> : vector<8xf32>
    %48 = vector.multi_reduction <add>, %45, %cst_19 [1] : vector<8x32xf32> to vector<8xf32>
    %49 = vector.shape_cast %48 : vector<8xf32> to vector<8x1xf32>
    %cst_20 = arith.constant 3.200000e+01 : f32
    %50 = vector.broadcast %cst_20 : f32 to vector<8x1xf32>
    %51 = arith.divf %49, %50 : vector<8x1xf32>
    %52 = arith.mulf %45, %45 : vector<8x32xf32>
    %cst_21 = arith.constant dense<0.000000e+00> : vector<8xf32>
    %53 = vector.multi_reduction <add>, %52, %cst_21 [1] : vector<8x32xf32> to vector<8xf32>
    %54 = vector.shape_cast %53 : vector<8xf32> to vector<8x1xf32>
    %cst_22 = arith.constant 3.200000e+01 : f32
    %55 = vector.broadcast %cst_22 : f32 to vector<8x1xf32>
    %56 = arith.divf %54, %55 : vector<8x1xf32>
    %57 = arith.mulf %51, %51 : vector<8x1xf32>
    %58 = arith.subf %56, %57 : vector<8x1xf32>
    %59 = vector.broadcast %51 : vector<8x1xf32> to vector<8x32xf32>
    %60 = arith.subf %45, %59 : vector<8x32xf32>
    %cst_23 = arith.constant 9.99999974E-6 : f32
    %61 = vector.broadcast %cst_23 : f32 to vector<8x1xf32>
    %62 = arith.addf %58, %61 : vector<8x1xf32>
    %63 = math.rsqrt %62 : vector<8x1xf32>
    %64 = vector.broadcast %63 : vector<8x1xf32> to vector<8x32xf32>
    %65 = arith.mulf %60, %64 : vector<8x32xf32>
    %66 = vector.broadcast %46 : vector<1x32xf32> to vector<8x32xf32>
    %67 = arith.mulf %65, %66 : vector<8x32xf32>
    %68 = vector.broadcast %47 : vector<1x32xf32> to vector<8x32xf32>
    %69 = arith.addf %67, %68 : vector<8x32xf32>
    %70 = arith.truncf %69 : vector<8x32xf32> to vector<8x32xbf16>
    %c0_24 = arith.constant 0 : index
    %c0_25 = arith.constant 0 : index
    %71 = vector.load %arg8[%c0_24, %c0_25] : memref<32x64xbf16, #tpu.memory_space<vmem>>, vector<32x64xbf16>
    %cst_26 = arith.constant dense<0.000000e+00> : vector<8x64xf32>
    %72 = tpu.matmul %70, %71, %cst_26 {dimension_numbers = #tpu.dot_dimension_numbers<[1], [0], [0], [1], [0, 0, 1, 1], [], []>} : vector<8x32xbf16>, vector<32x64xbf16>, vector<8x64xf32> -> vector<8x64xf32>
    %c0_27 = arith.constant 0 : index
    %c0_28 = arith.constant 0 : index
    %73 = vector.load %arg9[%c0_27, %c0_28] : memref<1x64xf32, #tpu.memory_space<vmem>>, vector<1x64xf32>
    %74 = vector.broadcast %73 : vector<1x64xf32> to vector<8x64xf32>
    %75 = arith.addf %72, %74 : vector<8x64xf32>
    %cst_29 = arith.constant 0.000000e+00 : f32
    %76 = vector.broadcast %cst_29 : f32 to vector<8x64xf32>
    %77 = arith.maximumf %75, %76 : vector<8x64xf32>
    %78 = arith.truncf %77 : vector<8x64xf32> to vector<8x64xbf16>
    %c0_30 = arith.constant 0 : index
    %c0_31 = arith.constant 0 : index
    %79 = vector.load %arg10[%c0_30, %c0_31] : memref<64x32xbf16, #tpu.memory_space<vmem>>, vector<64x32xbf16>
    %cst_32 = arith.constant dense<0.000000e+00> : vector<8x32xf32>
    %80 = tpu.matmul %78, %79, %cst_32 {dimension_numbers = #tpu.dot_dimension_numbers<[1], [0], [0], [1], [0, 0, 1, 1], [], []>} : vector<8x64xbf16>, vector<64x32xbf16>, vector<8x32xf32> -> vector<8x32xf32>
    %c0_33 = arith.constant 0 : index
    %c0_34 = arith.constant 0 : index
    %81 = vector.load %arg11[%c0_33, %c0_34] : memref<1x32xf32, #tpu.memory_space<vmem>>, vector<1x32xf32>
    %82 = vector.broadcast %81 : vector<1x32xf32> to vector<8x32xf32>
    %83 = arith.addf %80, %82 : vector<8x32xf32>
    %84 = arith.addf %69, %83 : vector<8x32xf32>
    %c0_35 = arith.constant 0 : index
    %c0_36 = arith.constant 0 : index
    %85 = vector.load %arg12[%c0_35, %c0_36] : memref<1x32xf32, #tpu.memory_space<vmem>>, vector<1x32xf32>
    %c0_37 = arith.constant 0 : index
    %c0_38 = arith.constant 0 : index
    %86 = vector.load %arg13[%c0_37, %c0_38] : memref<1x32xf32, #tpu.memory_space<vmem>>, vector<1x32xf32>
    %cst_39 = arith.constant dense<0.000000e+00> : vector<8xf32>
    %87 = vector.multi_reduction <add>, %84, %cst_39 [1] : vector<8x32xf32> to vector<8xf32>
    %88 = vector.shape_cast %87 : vector<8xf32> to vector<8x1xf32>
    %cst_40 = arith.constant 3.200000e+01 : f32
    %89 = vector.broadcast %cst_40 : f32 to vector<8x1xf32>
    %90 = arith.divf %88, %89 : vector<8x1xf32>
    %91 = arith.mulf %84, %84 : vector<8x32xf32>
    %cst_41 = arith.constant dense<0.000000e+00> : vector<8xf32>
    %92 = vector.multi_reduction <add>, %91, %cst_41 [1] : vector<8x32xf32> to vector<8xf32>
    %93 = vector.shape_cast %92 : vector<8xf32> to vector<8x1xf32>
    %cst_42 = arith.constant 3.200000e+01 : f32
    %94 = vector.broadcast %cst_42 : f32 to vector<8x1xf32>
    %95 = arith.divf %93, %94 : vector<8x1xf32>
    %96 = arith.mulf %90, %90 : vector<8x1xf32>
    %97 = arith.subf %95, %96 : vector<8x1xf32>
    %98 = vector.broadcast %90 : vector<8x1xf32> to vector<8x32xf32>
    %99 = arith.subf %84, %98 : vector<8x32xf32>
    %cst_43 = arith.constant 9.99999974E-6 : f32
    %100 = vector.broadcast %cst_43 : f32 to vector<8x1xf32>
    %101 = arith.addf %97, %100 : vector<8x1xf32>
    %102 = math.rsqrt %101 : vector<8x1xf32>
    %103 = vector.broadcast %102 : vector<8x1xf32> to vector<8x32xf32>
    %104 = arith.mulf %99, %103 : vector<8x32xf32>
    %105 = vector.broadcast %85 : vector<1x32xf32> to vector<8x32xf32>
    %106 = arith.mulf %104, %105 : vector<8x32xf32>
    %107 = vector.broadcast %86 : vector<1x32xf32> to vector<8x32xf32>
    %108 = arith.addf %106, %107 : vector<8x32xf32>
    %109 = vector.shape_cast %108 : vector<8x32xf32> to vector<1x8x32xf32>
    %c0_44 = arith.constant 0 : index
    %c0_45 = arith.constant 0 : index
    %c0_46 = arith.constant 0 : index
    %110 = vector.load %arg14[%c0_44, %c0_45, %c0_46] : memref<1x8x32xf32, #tpu.memory_space<vmem>>, vector<1x8x32xf32>
    tpu.vector_store %arg14[%c0_44, %c0_45, %c0_46], %109 {strides = array<i32>} : memref<1x8x32xf32, #tpu.memory_space<vmem>>, vector<1x8x32xf32>,
    return
  }
  func.func @transform_0(%arg0: i32) -> (i32, i32, i32) {
    %c0_i32 = arith.constant 0 : i32
    %c0_i32_0 = arith.constant 0 : i32
    %c0_i32_1 = arith.constant 0 : i32
    return %arg0, %c0_i32, %c0_i32_0 : i32, i32, i32
  }
  func.func @transform_1(%arg0: i32) -> (i32, i32) {
    %c0_i32 = arith.constant 0 : i32
    %c0_i32_0 = arith.constant 0 : i32
    %c0_i32_1 = arith.constant 0 : i32
    return %c0_i32, %c0_i32_0 : i32, i32
  }
  func.func @transform_2(%arg0: i32) -> (i32, i32) {
    %c0_i32 = arith.constant 0 : i32
    %c0_i32_0 = arith.constant 0 : i32
    %c0_i32_1 = arith.constant 0 : i32
    return %c0_i32, %c0_i32_0 : i32, i32
  }
  func.func @transform_3(%arg0: i32) -> (i32, i32) {
    %c0_i32 = arith.constant 0 : i32
    %c0_i32_0 = arith.constant 0 : i32
    %c0_i32_1 = arith.constant 0 : i32
    return %c0_i32, %c0_i32_0 : i32, i32
  }
  func.func @transform_4(%arg0: i32) -> (i32, i32) {
    %c0_i32 = arith.constant 0 : i32
    %c0_i32_0 = arith.constant 0 : i32
    %c0_i32_1 = arith.constant 0 : i32
    return %c0_i32, %c0_i32_0 : i32, i32
  }
  func.func @transform_5(%arg0: i32) -> (i32, i32) {
    %c0_i32 = arith.constant 0 : i32
    %c0_i32_0 = arith.constant 0 : i32
    %c0_i32_1 = arith.constant 0 : i32
    return %c0_i32, %c0_i32_0 : i32, i32
  }
  func.func @transform_6(%arg0: i32) -> (i32, i32) {
    %c0_i32 = arith.constant 0 : i32
    %c0_i32_0 = arith.constant 0 : i32
    %c0_i32_1 = arith.constant 0 : i32
    return %c0_i32, %c0_i32_0 : i32, i32
  }
  func.func @transform_7(%arg0: i32) -> (i32, i32) {
    %c0_i32 = arith.constant 0 : i32
    %c0_i32_0 = arith.constant 0 : i32
    %c0_i32_1 = arith.constant 0 : i32
    return %c0_i32, %c0_i32_0 : i32, i32
  }
  func.func @transform_8(%arg0: i32) -> (i32, i32) {
    %c0_i32 = arith.constant 0 : i32
    %c0_i32_0 = arith.constant 0 : i32
    %c0_i32_1 = arith.constant 0 : i32
    return %c0_i32, %c0_i32_0 : i32, i32
  }
  func.func @transform_9(%arg0: i32) -> (i32, i32) {
    %c0_i32 = arith.constant 0 : i32
    %c0_i32_0 = arith.constant 0 : i32
    %c0_i32_1 = arith.constant 0 : i32
    return %c0_i32, %c0_i32_0 : i32, i32
  }
  func.func @transform_10(%arg0: i32) -> (i32, i32) {
    %c0_i32 = arith.constant 0 : i32
    %c0_i32_0 = arith.constant 0 : i32
    %c0_i32_1 = arith.constant 0 : i32
    return %c0_i32, %c0_i32_0 : i32, i32
  }
  func.func @transform_11(%arg0: i32) -> (i32, i32) {
    %c0_i32 = arith.constant 0 : i32
    %c0_i32_0 = arith.constant 0 : i32
    %c0_i32_1 = arith.constant 0 : i32
    return %c0_i32, %c0_i32_0 : i32, i32
  }
  func.func @transform_12(%arg0: i32) -> (i32, i32) {
    %c0_i32 = arith.constant 0 : i32
    %c0_i32_0 = arith.constant 0 : i32
    %c0_i32_1 = arith.constant 0 : i32
    return %c0_i32, %c0_i32_0 : i32, i32
  }
  func.func @transform_13(%arg0: i32) -> (i32, i32, i32) {
    %c0_i32 = arith.constant 0 : i32
    %c0_i32_0 = arith.constant 0 : i32
    %c0_i32_1 = arith.constant 0 : i32
    return %arg0, %c0_i32, %c0_i32_0 : i32, i32, i32
  }
}

</mosaic_0001>

<bundles_post_ra>
// kernel: tpu_custom_call.1
= control target key start
LH: loop header
LB: loop body
LE: loop exit
PB: predicated region body
PF: predicated region fallthrough
CT: control target
= control target key end

     0   :  { %s2210_s0 = inlined_call_operand.vmem [shape: f32[2,8,32], index: 0, kind: input, shape index: {}]   ;;  %s2211_s1 = inlined_call_operand.vmem [shape: bf16[32,96], index: 1, kind: input, shape index: {}]   ;;  %s2212_s2 = inlined_call_operand.vmem [shape: f32[1,96], index: 2, kind: input, shape index: {}]   ;;  %s2213_s3 = inlined_call_operand.vmem [shape: bf16[32,32], index: 3, kind: input, shape index: {}]   ;;  %s2214_s4 = inlined_call_operand.vmem [shape: f32[1,32], index: 4, kind: input, shape index: {}]   ;;  %s2215_s5 = inlined_call_operand.vmem [shape: f32[1,32], index: 5, kind: input, shape index: {}]   ;;  %s2216_s6 = inlined_call_operand.vmem [shape: f32[1,32], index: 6, kind: input, shape index: {}]   ;;  %s2217_s7 = inlined_call_operand.hbm [shape: bf16[32,64], index: 7, kind: input, shape index: {}]   ;;  %s2218_s8 = inlined_call_operand.vmem [shape: f32[1,64], index: 8, kind: input, shape index: {}]   ;;  %s2219_s9 = inlined_call_operand.vmem [shape: bf16[64,32], index: 9, kind: input, shape index: {}]   ;;  %s2220_s10 = inlined_call_operand.vmem [shape: f32[1,32], index: 10, kind: input, shape index: {}]   ;;  %s2221_s11 = inlined_call_operand.vmem [shape: f32[1,32], index: 11, kind: input, shape index: {}]   ;;  %s2222_s12 = inlined_call_operand.vmem [shape: f32[1,32], index: 12, kind: input, shape index: {}]   ;;  %s2223_s13 = inlined_call_operand.hbm [shape: f32[2,8,32], index: 13, kind: output, shape index: {}]  }
   0x1   :  { %2230 = sst [smem:[#allocation11_spill]] %s2210_s0 }
   0x2   :  { %18 = vsyncpa [#allocation3], 0 }
   0x3   :  { %19 = vsyncpa [#allocation4], 0 }
   0x4   :  { %21 = vsyncpa [#allocation4 + $0x1], 0  ;;  %s1946_s25 = smov 0   ;;  %s1948_s26 = smov 0  }
   0x5   :  { %s1950_s27 = smov 0   ;;  %s1952_s28 = smov 0  }
   0x6 LB: > { %2231 = sst [smem:[#allocation8_spill]] %s1864_s27  ;;  %s1967_s29 = sadd.s32 4294967295, %s1868_s28   ;;  %s1868_s28 = sphi %s1952_s28, %s2244_s28   ;;  %s1864_s27 = sphi %s1950_s27, %s2246_s27   ;;  %s1860_s26 = sphi %s1948_s26, %s2248_s26   ;;  %s1856_s25 = sphi %s1946_s25, %s2247_s25  }
   0x7   : > { %s1519_s30 = sadd.s32 4294967294, %s1868_s28   ;;  %s1971_s14 = sadd.s32 1, %s1868_s28  }
   0x8   : > { %2232 = sst [smem:[#allocation9_spill]] %s1971_s14  ;;  %s312_s15 = sadd.s32 1, %s1864_s27 }
   0x9   : > { %s309_s16 = ssub.s32 %s1868_s28, %s1971_s14  ;;  %p322_p0 = scmp.ne.s32.totalorder %s1864_s27, %s1860_s26 }
   0xa   : > { %p310_p1 = scmp.eq.s32.totalorder %s309_s16, 0  ;;  %p323_p2 = scmp.eq.s32.totalorder %s1967_s29, 1 }
   0xb   : > { %p328_p3 = scmp.ne.s32.totalorder %s1860_s26, %s1856_s25  ;;  %p329_p4 = scmp.eq.s32.totalorder %s1519_s30, 1 }
   0xc   : > { %s1982_s17 = scalar_select %p310_p1, %s1864_s27, %s312_s15  }
   0xd   : > { %p1984_p5 = por %p323_p2, %p322_p0  ;;  %p1988_p6 = por %p329_p4, %p328_p3 }
   0xe   : > { %2233 = sst [smem:[#allocation10_spill]] %s1982_s17  ;;  %p1520_p7 = scmp.ge.s32.totalorder %s1868_s28, 1 }
   0xf   : > { %s2234_s18 = scalar_select %p1984_p5, 1, 0 }
  0x10   : > { %s2235_s19 = scalar_select %p1988_p6, 1, 0 }
  0x11   : > { %p336_p8 = scmp.lt.s32.totalorder %s1868_s28, 3  ;;  %p2227_p9 = scmp.eq.s32.totalorder %s1967_s29, 0 }
  0x12   : > { %s1870_s21 = smov [#allocation2]   ;;  %s1774_s15 = scalar_lea.hbm %s2217_s7, 256 }
  0x13   : > { %p1995_p10 = pnand %p1520_p7, %p336_p8  ;;  %s366_s22 = sshll.u32 %s1870_s21, 4  ;;  %s367_s22 = int_to_ptr.vmem [resolvable:$true] %s366_s22 }
  0x14   : > { %p1775_p13 = scmp.ne.s32.totalorder %s2217_s7, %s1774_s15  ;;  %p1781_p3 = scmp.lt.u32.totalorder %s1774_s15, %s2217_s7 }
  0x15   : > { %s2236_s20 = scalar_select %p1995_p10, 1, 0 }
  0x16   : > { %p1695_p11 = pneg %p1995_p10 }
  0x18   : > { %p2003_p12 = pnand %p2227_p9, %p1695_p11 }
  0x1a   : > { %p1776_p0 = pneg %p2003_p12 }
  0x1c   : > { %p1777_p1 = pnand %p1776_p0, %p1775_p13 }
  0x1e   : > { %p1778_p2 = pneg %p1777_p1 }
  0x20   : > { %p1783_p4 = pnand %p1781_p3, %p1778_p2 }
  0x22   : > { %1786 = shalt.err (!%p1783_p4)
}
  0x23   : > { %s1787_s14 = scalar_lea.vmem %s367_s22, 256  ;;  %p1795_p9 = scmp.lt.s32.totalorder %s367_s22, %s367_s22 }
  0x24   : > { %p1788_p7 = scmp.ne.s32.totalorder %s367_s22, %s1787_s14  ;;  %p1796_p6 = scmp.lt.s32.totalorder %s1787_s14, %s1787_s14 }
  0x26   : > { %p1790_p8 = pnand %p1788_p7, %p1776_p0  ;;  %p1797_p5 = por %p1796_p6, %p1795_p9 }
  0x28   : > { %p1791_p11 = pneg %p1790_p8 }
  0x2a   : > { %p1798_p10 = pnand %p1797_p5, %p1791_p11 }
  0x2c   : > { %1801 = shalt.err (!%p1798_p10)
}
  0x2d   : > { %s1871_s17 = smov 64   ;;  %s1872_s24 = smov 4  }
  0x2e   : > { %1698 = dma.hbm_to_vmem [thread:$0]  (!%p2003_p12), %s2217_s7, 256, %s367_s22, [#allocation3], %s1871_s17, %s1871_s17, %s1872_s24  }
  0x2f   : > { %p2238_p13 = scmp.ne.s32.totalorder %s2236_s20, 0 }
  0x30   : > { %p2239_p1 = scmp.eq.s32.totalorder (!%p2238_p13), %s1967_s29, 0 }
  0x31   : > { %404 = sbr.rel (%p2238_p13) target bundleno = 2465 (0x9a1), region = 72 }
  0x38   : > { %1847 = dma.done.wait (%p2239_p1), [#allocation3], 256   ;;  %p2240_p0 = pmov %p2239_p1 }
  0x39   : > { %p447_p5 = scmp.lt.s32.totalorder %s1967_s29, 1  ;;  %v1873_v0 = vmov 0.0   ;;  %vm1874_vm0 = vmmov 0   ;;  %s2241_s0 = sld [smem:[#allocation11_spill]]  ;;  %v1744_v1 = vld [vmem:[%s2211_s1] sm:$0xff]   ;;  %v1745_v2 = vld [vmem:[%s2211_s1 + $0x8] sm:$0xff]  }
  0x3a   : > { %1849 = vsyncadd (%p2240_p0), [#allocation3], 4294967040  ;;  %1605 = vmatprep.subr.bf16.mxu0 %v1873_v0  ;;  %1609 = vmatprep.mubr.msk.bf16.mxu0 %vm1874_vm0, %v1873_v0  ;;  %vm477_vm1 = vcmask 261120   ;;  %v1527_v5 = vld [vmem:[%s2212_s2] ss:$0 sm:$0xff]  ;;  %vm640_vm2 = vcmask 1043456  }
  0x3b   : > { %s448_s27 = scalar_select %p447_p5, %s1967_s29, 1  ;;  %1613 = vmatprep.subr.bf16.mxu1 %v1873_v0  ;;  %1615 = vmatprep.mubr.msk.bf16.mxu1 %vm1874_vm0, %v1873_v0  ;;  %vm636_vm3 = vcmask 64512   ;;  %vm1357_vm4 = vcmask 523264  }
  0x3c   : > { %1606 = vmatpush3.bf16.msra.mxu0 %v1744_v1  ;;  %s1572_s21 = sshll.u32 %s1967_s29, 7  ;;  %p2242_p9 = scmp.ne.s32.totalorder %s2234_s18, 0 }
  0x3d   : > { %s1526_s14 = sshll.u32 %s448_s27, 3  ;;  %1607 = vmatprep.subr.bf16.mxu0 %v1873_v0  ;;  %s444_s27 = sand.u32 1, %s1860_s26  }
  0x3e   : > { %s1435_s20 = scalar_lea.sflag [#allocation4], %s444_s27  ;;  %s1875_s29 = smov [#allocation5]  }
  0x3f   : > { %s450_s23 = scalar_lea.vmem %s2241_s0, %s1526_s14  ;;  %s1525_s14 = sshll.u32 %s444_s27, 3 }
  0x40   : > { %v2046_v3 = vld [vmem:[%s450_s23] sm:$0xff]  ;;  %1608 = vmatpush3.bf16.msra.mxu0 %v1745_v2  ;;  %s446_s17 = scalar_lea.vmem [#allocation5], %s1525_s14  ;;  %s2167_s0 = scalar_lea.hbm %s2223_s13, %s1572_s21 }
  0x41   : > { %v453_v4 = vpack.c.bf16 %v2046_v3, %v2046_v3  ;;  %1637 = vmatprep.subr.bf16.mxu0 %v1873_v0  ;;  %s1448_s24 = sshll.u32 %s446_s17, 4  ;;  %s1806_s14 = sshll.u32 %s1875_s29, 4  ;;  %s2169_s24 = int_to_ptr.vmem [resolvable:$true] %s1448_s24  ;;  %s1807_s14 = int_to_ptr.vmem [resolvable:$false] %s1806_s14 }
  0x42   : > { %s1802_s22 = scalar_lea.vmem %s2169_s24, 128  ;;  %s1808_s23 = scalar_lea.vmem %s1807_s14, 256 }
  0x43   : > { %1610 = vmatmul.mubr.msk.bf16.vlgmr.msra.gmra.mrb[0].mxu0 %vm477_vm1, %v453_v4  ;;  %p1803_p6 = scmp.ne.s32.totalorder %s2169_s24, %s1802_s22  ;;  %p1809_p2 = scmp.lt.s32.totalorder %s2169_s24, %s1807_s14 }
  0x44   : > { %1639 = vmatprep.mubr.msk.bf16.mxu0 %vm1874_vm0, %v1873_v0  ;;  %p1810_p3 = scmp.lt.s32.totalorder %s1808_s23, %s1802_s22 }
  0x45   : > { %p1804_p10 = pnand %p1803_p6, %p2242_p9 }
  0x46   : > { %p1811_p4 = por %p1810_p3, %p1809_p2 }
  0x47   : > { %p1805_p12 = pneg %p1804_p10 }
  0x49   : > { %p1812_p7 = pnand %p1811_p4, %p1805_p12 }
 0x116   : > { %v515_v6 = vpop.f32.mrb[0].mxu0 }
 0x117   : > { %v1611_v7 = vpop.f32.mrb[1].mxu0  ;;  %v516_v8 = vadd.f32 %v1527_v5, %v515_v6 }
 0x118   : > { %v518_v9 = vpop.f32.mrb[2].mxu0 }
 0x119   : > { %v1612_v10 = vpop.f32.mrb[3].mxu0  ;;  %v521_v11 = vpack.c.bf16 %v516_v8, %v516_v8 }
 0x11b   : > { %522 = vxpose.xlu0.c.b16.start.end [1/1] (short) (narrow) %v521_v11, 96 }
 0x181   : > { %v530_v12 = vpop.trf.xlu0 }
 0x182   : > { %v1532_v13 = vcombine.high %v530_v12, %v530_v12  ;;  %v1531_v14 = vcombine.low %v530_v12, %v530_v12 }
 0x184   : > { %588 = vxpose.xlu1.c.b16.start.end [1/1] (short) (narrow) %v1532_v13, 16  ;;  %572 = vxpose.xlu0.c.b16.start.end [1/1] (short) (narrow) %v1531_v14, 16 }
 0x185   : > { %v531_v15 = vpop.trf.xlu0 }
 0x186   : > { %v1533_v16 = vcombine.low %v531_v15, %v531_v15  ;;  %v1534_v17 = vcombine.high %v531_v15, %v531_v15 }
 0x188   : > { %604 = vxpose.xlu1.c.b16.start.end [1/1] (short) (narrow) %v1533_v16, 16 }
 0x189   : > { %v532_v18 = vpop.trf.xlu0 }
 0x18a   : > { %v1535_v19 = vcombine.low %v532_v18, %v532_v18  ;;  %v1536_v20 = vcombine.high %v532_v18, %v532_v18 }
 0x18c   : > { %620 = vxpose.xlu1.c.b16.start.end [1/1] (short) (narrow) %v1534_v17, 16  ;;  %v642_v21 = vsel %vm640_vm2, %v1535_v19, 0  ;;  %v688_v22 = vsel %vm640_vm2, %v1536_v20, 0 }
 0x18d   : > { %1614 = vmatpush3.bf16.msra.mxu1 %v642_v21  ;;  %v533_v23 = vpop.trf.xlu0 }
 0x18e   : > { %v1537_v24 = vcombine.low %v533_v23, %v533_v23  ;;  %v1538_v25 = vcombine.high %v533_v23, %v533_v23  ;;  %1619 = vmatprep.subr.bf16.mxu1 %v1873_v0 }
 0x190   : > { %v734_v26 = vsel %vm640_vm2, %v1537_v24, 0  ;;  %v780_v27 = vsel %vm640_vm2, %v1538_v25, 0 }
 0x191   : > { %v534_v28 = vpop.trf.xlu0 }
 0x192   : > { %v1539_v29 = vcombine.low %v534_v28, %v534_v28  ;;  %v1540_v35 = vcombine.high %v534_v28, %v534_v28 }
 0x194   : > { %v874_v30 = vsel %vm636_vm3, %v1539_v29, 0  ;;  %v920_v37 = vsel %vm636_vm3, %v1540_v35, 0 }
 0x195   : > { %1638 = vmatpush3.bf16.xpose.msra.mxu0 %v874_v30  ;;  %v2061_v31 = vpop.trf.xlu0 }
 0x196   : > { %1649 = vmatprep.subr.bf16.mxu0 %v1873_v0  ;;  %v1541_v19 = vcombine.low %v2061_v31, %v2061_v31  ;;  %v1542_v25 = vcombine.high %v2061_v31, %v2061_v31 }
 0x198   : > { %v966_v23 = vsel %vm636_vm3, %v1541_v19, 0  ;;  %v1012_v28 = vsel %vm636_vm3, %v1542_v25, 0  ;;  %v1557_v25 = vld [vmem:[%s2215_s5] ss:$0 sm:$0xff] }
 0x1ea   : > { %v580_v32 = vpop.trf.xlu0  ;;  %v596_v33 = vpop.trf.xlu1 }
 0x1eb   : > { %1616 = vmatmul.mubr.msk.bf16.vlgmr.msra.gmra.mrb[0].mxu1 %vm636_vm3, %v580_v32 }
 0x1ec   : > { %1620 = vmatpush3.bf16.msra.mxu1 %v688_v22  ;;  %1621 = vmatprep.mubr.msk.bf16.mxu1 %vm1874_vm0, %v1873_v0 }
 0x1ed   : > { %1625 = vmatprep.subr.bf16.mxu1 %v1873_v0 }
 0x1ee   : > { %v612_v34 = vpop.trf.xlu1 }
 0x1f2   : > { %v628_v36 = vpop.trf.xlu1 }
 0x1f3   : > { %1622 = vmatmul.mubr.msk.bf16.vlgmr.msra.gmra.mrb[4].mxu1 %vm636_vm3, %v596_v33 }
 0x1f4   : > { %1626 = vmatpush3.bf16.msra.mxu1 %v734_v26  ;;  %1627 = vmatprep.mubr.msk.bf16.mxu1 %vm1874_vm0, %v1873_v0 }
 0x1f5   : > { %1631 = vmatprep.subr.bf16.mxu1 %v1873_v0 }
 0x1fb   : > { %1628 = vmatmul.mubr.msk.bf16.vlgmr.msra.gmra.mrb[8].mxu1 %vm636_vm3, %v612_v34 }
 0x1fc   : > { %1632 = vmatpush3.bf16.msra.mxu1 %v780_v27  ;;  %1633 = vmatprep.mubr.msk.bf16.mxu1 %vm1874_vm0, %v1873_v0 }
 0x1fd   : > { %1643 = vmatprep.subr.bf16.mxu1 %v1873_v0 }
 0x203   : > { %1634 = vmatmul.mubr.msk.bf16.vlgmr.msra.gmra.mrb[12].mxu1 %vm636_vm3, %v628_v36 }
 0x204   : > { %1645 = vmatprep.mubr.msk.bf16.mxu1 %vm1874_vm0, %v1873_v0 }
 0x205   : > { %1644 = vmatpush3.bf16.xpose.msra.mxu1 %v920_v37 }
 0x206   : > { %1655 = vmatprep.subr.bf16.mxu1 %v1873_v0 }
 0x2be   : > { %v678_v38 = vpop.f32.mrb[0].mxu1 }
 0x2bf   : > { %v1617_v39 = vpop.f32.mrb[1].mxu1  ;;  %v822_v40 = vsel %vm636_vm3, %v678_v38, -inf }
 0x2c0   : > { %823 = vmax.xlane.f32.xlu1 %v822_v40  ;;  %v681_v41 = vpop.f32.mrb[2].mxu1 }
 0x2c1   : > { %v1618_v42 = vpop.f32.mrb[3].mxu1  ;;  %v1746_v41 = vld [vmem:[%s2213_s3] sm:$0xff]  }
 0x2c2   : > { %v1747_v42 = vld [vmem:[%s2213_s3 + $0x8] sm:$0xff]  }
 0x2c6   : > { %v724_v43 = vpop.f32.mrb[4].mxu1 }
 0x2c7   : > { %v1623_v44 = vpop.f32.mrb[5].mxu1  ;;  %v825_v45 = vsel %vm636_vm3, %v724_v43, -inf }
 0x2c8   : > { %826 = vmax.xlane.f32.xlu0 %v825_v45  ;;  %v727_v46 = vpop.f32.mrb[6].mxu1 }
 0x2c9   : > { %v1624_v47 = vpop.f32.mrb[7].mxu1 }
 0x2ce   : > { %v770_v48 = vpop.f32.mrb[8].mxu1 }
 0x2cf   : > { %v1629_v49 = vpop.f32.mrb[9].mxu1  ;;  %v828_v50 = vsel %vm636_vm3, %v770_v48, -inf }
 0x2d0   : > { %829 = vmax.xlane.f32.xlu1 %v828_v50  ;;  %v773_v51 = vpop.f32.mrb[10].mxu1 }
 0x2d1   : > { %v1630_v52 = vpop.f32.mrb[11].mxu1 }
 0x2d6   : > { %v816_v53 = vpop.f32.mrb[12].mxu1 }
 0x2d7   : > { %v1635_v54 = vpop.f32.mrb[13].mxu1  ;;  %v831_v55 = vsel %vm636_vm3, %v816_v53, -inf }
 0x2d8   : > { %832 = vmax.xlane.f32.xlu1 %v831_v55  ;;  %v819_v56 = vpop.f32.mrb[14].mxu1 }
 0x2d9   : > { %v1636_v57 = vpop.f32.mrb[15].mxu1 }
 0x34d   : > { %v824_v58 = vpop.xlane.xlu1 %823 }
 0x34e   : > { %v834_v59 = vsub.f32 %v678_v38, %v824_v58 }
 0x350   : > { %v838_v60 = vmul.f32 1.442695, %v834_v59 }
 0x352   : > { %1754 = vpow2.f32 %v838_v60 }
 0x355   : > { %v827_v61 = vpop.xlane.xlu0 %826 }
 0x356   : > { %v835_v62 = vsub.f32 %v724_v43, %v827_v61 }
 0x358   : > { %v840_v63 = vmul.f32 1.442695, %v835_v62 }
 0x35a   : > { %1756 = vpow2.f32 %v840_v63 }
 0x35c   : > { %v1755_v1 = vpop.eup %1754 }
 0x35d   : > { %v830_v2 = vpop.xlane.xlu1 %829  ;;  %v846_v4 = vsel %vm636_vm3, %v1755_v1, 0.0 }
 0x35e   : > { %v836_v5 = vsub.f32 %v770_v48, %v830_v2  ;;  %847 = vadd.xlane.f32.xlu1 %v846_v4  ;;  %v1553_v2 = vld [vmem:[%s2214_s4] ss:$0 sm:$0xff] }
 0x360   : > { %v842_v6 = vmul.f32 1.442695, %v836_v5 }
 0x362   : > { %1758 = vpow2.f32 %v842_v6 }
 0x364   : > { %v1757_v7 = vpop.eup %1756 }
 0x365   : > { %v833_v8 = vpop.xlane.xlu1 %832  ;;  %v849_v9 = vsel %vm636_vm3, %v1757_v7, 0.0 }
 0x366   : > { %v837_v10 = vsub.f32 %v816_v53, %v833_v8  ;;  %850 = vadd.xlane.f32.xlu1 %v849_v9 }
 0x368   : > { %v844_v11 = vmul.f32 1.442695, %v837_v10 }
 0x36a   : > { %1760 = vpow2.f32 %v844_v11 }
 0x36c   : > { %v1759_v12 = vpop.eup %1758 }
 0x36d   : > { %v852_v13 = vsel %vm636_vm3, %v1759_v12, 0.0 }
 0x36e   : > { %853 = vadd.xlane.f32.xlu0 %v852_v13  ;;  %v1748_v13 = vld [vmem:[#allocation2] sm:$0xff]  }
 0x374   : > { %v1761_v14 = vpop.eup %1760 }
 0x375   : > { %v855_v15 = vsel %vm636_vm3, %v1761_v14, 0.0 }
 0x376   : > { %856 = vadd.xlane.f32.xlu1 %v855_v15  ;;  %v1750_v15 = vld [vmem:[%s2219_s9] sm:$0xff]  }
 0x3eb   : > { %v848_v16 = vpop.xlane.xlu1 %847 }
 0x3ec   : > { %1762 = vrcp.f32 %v848_v16 }
 0x3f3   : > { %v851_v17 = vpop.xlane.xlu1 %850 }
 0x3f4   : > { %1764 = vrcp.f32 %v851_v17 }
 0x3f6   : > { %v1763_v18 = vpop.eup %1762 }
 0x3f7   : > { %v862_v20 = vmul.f32 %v1763_v18, %v1755_v1 }
 0x3f9   : > { %v866_v21 = vpack.c.bf16 %v862_v20, %v862_v20 }
 0x3fb   : > { %v854_v22 = vpop.xlane.xlu0 %853  ;;  %1640 = vmatmul.mubr.msk.bf16.vlgmr.msra.gmra.mrb[4].mxu0 %vm636_vm3, %v866_v21 }
 0x3fc   : > { %1766 = vrcp.f32 %v854_v22  ;;  %1650 = vmatpush3.bf16.xpose.msra.mxu0 %v966_v23  ;;  %1651 = vmatprep.mubr.msk.bf16.mxu0 %vm1874_vm0, %v1873_v0 }
 0x3fd   : > { %1661 = vmatprep.subr.bf16.mxu0 %v1873_v0 }
 0x3fe   : > { %v1765_v24 = vpop.eup %1764 }
 0x3ff   : > { %v863_v26 = vmul.f32 %v1765_v24, %v1757_v7 }
 0x401   : > { %v867_v27 = vpack.c.bf16 %v863_v26, %v863_v26 }
 0x403   : > { %1646 = vmatmul.mubr.msk.bf16.vlgmr.msra.gmra.mrb[16].mxu1 %vm636_vm3, %v867_v27  ;;  %v857_v29 = vpop.xlane.xlu1 %856  ;;  %v1558_v27 = vld [vmem:[%s2216_s6] ss:$0 sm:$0xff] }
 0x404   : > { %1656 = vmatpush3.bf16.xpose.msra.mxu1 %v1012_v28  ;;  %1768 = vrcp.f32 %v857_v29  ;;  %1657 = vmatprep.mubr.msk.bf16.mxu1 %vm1874_vm0, %v1873_v0 }
 0x405   : > { %1669 = vmatprep.subr.bf16.mxu1 %v1873_v0 }
 0x406   : > { %v1767_v30 = vpop.eup %1766 }
 0x407   : > { %v864_v32 = vmul.f32 %v1767_v30, %v1759_v12 }
 0x409   : > { %v868_v33 = vpack.c.bf16 %v864_v32, %v864_v32  ;;  %v1752_v32 = vld [vmem:[%s2219_s9 + $0x10] sm:$0xff]  }
 0x40b   : > { %1652 = vmatmul.mubr.msk.bf16.vlgmr.msra.gmra.mrb[8].mxu0 %vm636_vm3, %v868_v33  ;;  %v1753_v33 = vld [vmem:[%s2219_s9 + $0x18] sm:$0xff]  }
 0x40c   : > { %1665 = vmatprep.mubr.msk.bf16.mxu0 %vm1874_vm0, %v1873_v0  ;;  %1662 = vmatpush3.bf16.msra.mxu0 %v1746_v41 }
 0x40d   : > { %1663 = vmatprep.subr.bf16.mxu0 %v1873_v0 }
 0x40e   : > { %v1769_v31 = vpop.eup %1768 }
 0x40f   : > { %v865_v34 = vmul.f32 %v1769_v31, %v1761_v14  ;;  %v1749_v14 = vld [vmem:[#allocation2 + $0x8] sm:$0xff]   ;;  %v1559_v31 = vld [vmem:[%s2218_s8] ss:$0 sm:$0xff] }
 0x410   : > { %1664 = vmatpush3.bf16.msra.mxu0 %v1747_v42 }
 0x411   : > { %v869_v35 = vpack.c.bf16 %v865_v34, %v865_v34  ;;  %1677 = vmatprep.subr.bf16.mxu0 %v1873_v0 }
 0x413   : > { %1658 = vmatmul.mubr.msk.bf16.vlgmr.msra.gmra.mrb[20].mxu1 %vm636_vm3, %v869_v35 }
 0x414   : > { %1673 = vmatprep.mubr.msk.bf16.mxu1 %vm1874_vm0, %v1873_v0  ;;  %1670 = vmatpush3.bf16.msra.mxu1 %v1748_v13 }
 0x415   : > { %1671 = vmatprep.subr.bf16.mxu1 %v1873_v0 }
 0x418   : > { %1672 = vmatpush3.bf16.msra.mxu1 %v1749_v14 }
 0x4ce   : > { %v910_v36 = vpop.f32.mrb[4].mxu0 }
 0x4cf   : > { %v1054_v37 = vpack.c.bf16 %v910_v36, %v910_v36  ;;  %v1641_v38 = vpop.f32.mrb[5].mxu0 }
 0x4d0   : > { %v913_v39 = vpop.f32.mrb[6].mxu0 }
 0x4d1   : > { %1058 = vxpose.xlu0.c.b16.start.end [1/1] (short) (narrow) %v1054_v37, 16  ;;  %v1642_v40 = vpop.f32.mrb[7].mxu0 }
 0x4d6   : > { %v956_v43 = vpop.f32.mrb[16].mxu1 }
 0x4d7   : > { %v1055_v44 = vpack.c.bf16 %v956_v43, %v956_v43  ;;  %v1647_v45 = vpop.f32.mrb[17].mxu1 }
 0x4d8   : > { %v959_v46 = vpop.f32.mrb[18].mxu1 }
 0x4d9   : > { %1074 = vxpose.xlu1.c.b16.start.end [1/1] (short) (narrow) %v1055_v44, 16  ;;  %v1648_v47 = vpop.f32.mrb[19].mxu1 }
 0x4de   : > { %v1002_v48 = vpop.f32.mrb[8].mxu0 }
 0x4df   : > { %v1056_v49 = vpack.c.bf16 %v1002_v48, %v1002_v48  ;;  %v1653_v50 = vpop.f32.mrb[9].mxu0 }
 0x4e0   : > { %v1005_v51 = vpop.f32.mrb[10].mxu0 }
 0x4e1   : > { %1090 = vxpose.xlu0.c.b16.start.end [1/1] (short) (narrow) %v1056_v49, 16  ;;  %v1654_v52 = vpop.f32.mrb[11].mxu0 }
 0x4e6   : > { %v1048_v53 = vpop.f32.mrb[20].mxu1 }
 0x4e7   : > { %v1057_v54 = vpack.c.bf16 %v1048_v53, %v1048_v53  ;;  %v1659_v55 = vpop.f32.mrb[21].mxu1 }
 0x4e8   : > { %v1051_v56 = vpop.f32.mrb[22].mxu1 }
 0x4e9   : > { %1106 = vxpose.xlu1.c.b16.start.end [1/1] (short) (narrow) %v1057_v54, 16  ;;  %v1660_v57 = vpop.f32.mrb[23].mxu1 }
 0x537   : > { %v1066_v58 = vpop.trf.xlu0 }
 0x53f   : > { %v1082_v59 = vpop.trf.xlu1 }
 0x540   : > { %v1551_v60 = vcombine.low %v1066_v58, %v1082_v59  ;;  %v1569_v59 = vld [vmem:[%s2221_s11] ss:$0 sm:$0xff] }
 0x542   : > { %1134 = vxpose.xlu0.c.b16.start [1/2] (short) (narrow) %v1551_v60, 16 }
 0x547   : > { %v1098_v61 = vpop.trf.xlu0 }
 0x54f   : > { %v1114_v62 = vpop.trf.xlu1 }
 0x550   : > { %v1552_v63 = vcombine.low %v1098_v61, %v1114_v62  ;;  %v1570_v61 = vld [vmem:[%s2222_s12] ss:$0 sm:$0xff] }
 0x552   : > { %1135 = vxpose.xlu0.c.b16.end [2/2] (short) (narrow) %v1552_v63, 16 }
 0x5b4   : > { %v1142_v1 = vpop.trf.xlu0 }
 0x5b5   : > { %1666 = vmatmul.mubr.msk.bf16.vlgmr.msra.gmra.mrb[12].mxu0 %vm477_vm1, %v1142_v1 }
 0x5b6   : > { %1685 = vmatprep.mubr.msk.bf16.mxu0 %vm1874_vm0, %v1873_v0  ;;  %1678 = vmatpush3.bf16.msra.mxu0 %v1750_v15 }
 0x5b7   : > { %1679 = vmatprep.subr.bf16.mxu0 %v1873_v0 }
 0x688   : > { %v1210_v4 = vpop.f32.mrb[12].mxu0 }
 0x689   : > { %v1211_v5 = vadd.f32 %v1553_v2, %v1210_v4  ;;  %v1667_v6 = vpop.f32.mrb[13].mxu0 }
 0x68a   : > { %v1213_v7 = vpop.f32.mrb[14].mxu0 }
 0x68b   : > { %v1216_v8 = vadd.f32 %v1211_v5, %v2046_v3  ;;  %v1668_v9 = vpop.f32.mrb[15].mxu0  ;;  %v1751_v3 = vld [vmem:[%s2219_s9 + $0x8] sm:$0xff]  }
 0x68c   : > { %1680 = vmatpush3.bf16.msra.mxu0 %v1751_v3 }
 0x68d   : > { %v1219_v10 = vsel %vm477_vm1, %v1216_v8, 0.0  ;;  %v1224_v11 = vmul.f32 %v1216_v8, %v1216_v8  ;;  %1681 = vmatprep.subr.bf16.mxu0 %v1873_v0 }
 0x68e   : > { %1220 = vadd.xlane.f32.xlu1 %v1219_v10 }
 0x68f   : > { %v1225_v12 = vsel %vm477_vm1, %v1224_v11, 0.0 }
 0x690   : > { %1226 = vadd.xlane.f32.xlu0 %v1225_v12  ;;  %1682 = vmatpush3.bf16.msra.mxu0 %v1752_v32 }
 0x691   : > { %1683 = vmatprep.subr.bf16.mxu0 %v1873_v0  ;;  %v1563_v0 = vld [vmem:[%s2220_s10] ss:$0 sm:$0xff] }
 0x694   : > { %1684 = vmatpush3.bf16.msra.mxu0 %v1753_v33 }
 0x71b   : > { %v1221_v16 = vpop.xlane.xlu1 %1220 }
 0x71c   : > { %v1223_v17 = vmul.f32 0.03125, %v1221_v16 }
 0x71d   : > { %v1227_v18 = vpop.xlane.xlu0 %1226 }
 0x71e   : > { %v1229_v19 = vmul.f32 %v1223_v17, %v1223_v17  ;;  %v1228_v20 = vmul.f32 0.03125, %v1227_v18  ;;  %v1231_v23 = vsub.f32 %v1216_v8, %v1223_v17 }
 0x720   : > { %v1230_v21 = vsub.f32 %v1228_v20, %v1229_v19 }
 0x722   : > { %v1232_v22 = vadd.f32 1e-05, %v1230_v21 }
 0x724   : > { %1770 = vrsqrt.f32 %v1232_v22 }
 0x72e   : > { %v1771_v24 = vpop.eup %1770 }
 0x72f   : > { %v1234_v26 = vmul.f32 %v1771_v24, %v1231_v23 }
 0x731   : > { %v1241_v28 = vmul.f32 %v1557_v25, %v1234_v26 }
 0x733   : > { %v1248_v29 = vadd.f32 %v1558_v27, %v1241_v28 }
 0x735   : > { %v1249_v30 = vpack.c.bf16 %v1248_v29, %v1248_v29 }
 0x737   : > { %1674 = vmatmul.mubr.msk.bf16.vlgmr.msra.gmra.mrb[24].mxu1 %vm477_vm1, %v1249_v30 }
 0x80a   : > { %v1310_v34 = vpop.f32.mrb[24].mxu1 }
 0x80b   : > { %v1311_v35 = vadd.f32 %v1559_v31, %v1310_v34  ;;  %v1675_v36 = vpop.f32.mrb[25].mxu1 }
 0x80c   : > { %v1313_v37 = vpop.f32.mrb[26].mxu1 }
 0x80d   : > { %v1316_v38 = vmax.f32 %v1311_v35, 0.0  ;;  %v1676_v39 = vpop.f32.mrb[27].mxu1 }
 0x80f   : > { %v1317_v40 = vpack.c.bf16 %v1316_v38, %v1316_v38 }
 0x811   : > { %1686 = vmatmul.mubr.msk.bf16.vlgmr.msra.gmra.mrb[16].mxu0 %vm1357_vm4, %v1317_v40 }
 0x8e4   : > { %v1395_v41 = vpop.f32.mrb[16].mxu0 }
 0x8e5   : > { %v1396_v42 = vadd.f32 %v1563_v0, %v1395_v41  ;;  %v1687_v43 = vpop.f32.mrb[17].mxu0 }
 0x8e6   : > { %v1398_v44 = vpop.f32.mrb[18].mxu0 }
 0x8e7   : > { %v1401_v45 = vadd.f32 %v1396_v42, %v1248_v29  ;;  %v1688_v46 = vpop.f32.mrb[19].mxu0 }
 0x8e9   : > { %v1404_v47 = vsel %vm477_vm1, %v1401_v45, 0.0  ;;  %v1408_v48 = vmul.f32 %v1401_v45, %v1401_v45 }
 0x8ea   : > { %1405 = vadd.xlane.f32.xlu1 %v1404_v47 }
 0x8eb   : > { %v1409_v49 = vsel %vm477_vm1, %v1408_v48, 0.0 }
 0x8ee   : > { %1410 = vadd.xlane.f32.xlu1 %v1409_v49 }
 0x977   : > { %v1406_v50 = vpop.xlane.xlu1 %1405 }
 0x978   : > { %v1407_v51 = vmul.f32 0.03125, %v1406_v50 }
 0x97a   : > { %v1413_v53 = vmul.f32 %v1407_v51, %v1407_v51  ;;  %v1415_v57 = vsub.f32 %v1401_v45, %v1407_v51 }
 0x97b   : > { %v1411_v52 = vpop.xlane.xlu1 %1410 }
 0x97c   : > { %v1412_v54 = vmul.f32 0.03125, %v1411_v52 }
 0x97e   : > { %v1414_v55 = vsub.f32 %v1412_v54, %v1413_v53 }
 0x980   : > { %v1416_v56 = vadd.f32 1e-05, %v1414_v55 }
 0x982   : > { %1772 = vrsqrt.f32 %v1416_v56 }
 0x98c   : > { %v1773_v58 = vpop.eup %1772 }
 0x98d   : > { %v1418_v60 = vmul.f32 %v1773_v58, %v1415_v57 }
 0x98f   : > { %v1425_v62 = vmul.f32 %v1569_v59, %v1418_v60 }
 0x991   : > { %v1432_v63 = vadd.f32 %v1570_v61, %v1425_v62 }
 0x993   : > { %1433 = vst.msk [vmem:[%s446_s17] sm:$0xff] %vm477_vm1, %v1432_v63 }
 0x994   : > { %1815 = shalt.err (!%p1812_p7)
}
 0x995   : > { %s1816_s27 = scalar_lea.hbm %s2167_s0, 128  ;;  %s1820_s17 = scalar_lea.hbm %s2223_s13, 256 }
 0x996   : > { %p1817_p8 = scmp.ne.s32.totalorder %s2167_s0, %s1816_s27  ;;  %p1821_p1 = scmp.lt.u32.totalorder %s2167_s0, %s2223_s13 }
 0x997   : > { %p1822_p0 = scmp.lt.u32.totalorder %s1820_s17, %s1816_s27  ;;  %p1824_p6 = scmp.lt.u32.totalorder %s1816_s27, %s2167_s0 }
 0x998   : > { %p1818_p11 = pnand %p1817_p8, %p2242_p9 }
 0x999   : > { %p1823_p5 = por %p1822_p0, %p1821_p1 }
 0x99a   : > { %p1819_p13 = pneg %p1818_p11 }
 0x99b   : > { %p1825_p10 = por %p1824_p6, %p1823_p5 }
 0x99d   : > { %p1826_p12 = pnand %p1825_p10, %p1819_p13 }
 0x99f   : > { %1829 = shalt.err (!%p1826_p12)
}
 0x9a0   : > { %1693 = dma.vmem_to_hbm [thread:$0]  (%p2242_p9), %s2169_s24, 128, %s2167_s0, %s1435_s20  }
 0x9a1 PF: > { %p1705_p2 = scmp.ge.s32.totalorder %s1868_s28, 2  ;;  %s1460_s22 = sand.u32 1, %s1856_s25  }
 0x9a2   : > { %p2243_p3 = scmp.ne.s32.totalorder %s2235_s19, 0  ;;  %s1461_s29 = scalar_lea.sflag [#allocation4], %s1460_s22 }
 0x9a4   : > { %p1700_p4 = pnand %p1705_p2, %p2243_p3 }
 0x9a6   : > { %1851 = dma.done.wait (!%p1700_p4), %s1461_s29, 128  }
 0x9a7   : > { %1853 = vsyncadd (!%p1700_p4), %s1461_s29, 4294967168  ;;  %s2244_s28 = sld [smem:[#allocation9_spill]]  ;;  %s2245_s14 = sld [smem:[#allocation8_spill]] }
 0x9a8   : > { %s2246_s27 = sld [smem:[#allocation10_spill]]  ;;  %s2247_s25 = smov %s1860_s26 }
 0x9ad   : > { %p24_p7 = scmp.ge.s32.totalorder %s2244_s28, 4   ;;  %s2248_s26 = smov %s2245_s14 }
 0x9af   :  { %26 = sbr.rel (!%p24_p7) target bundleno = 6 (0x6), region = 112 }
 0x9b6   :  { %1466 = vsyncpa [#allocation3], 1 }
 0x9b7   :  { %1468 = vsyncpa [#allocation3 + $0x1], 1 }
 0x9b8   :  { %1469 = vsyncpa [#allocation4], 1 }
 0x9b9   :  { %1471 = vsyncpa [#allocation4 + $0x1], 1 }

// kernel: tpu_custom_call.1
= control target key start
LH: loop header
LB: loop body
LE: loop exit
PB: predicated region body
PF: predicated region fallthrough
CT: control target
= control target key end

     0   :  { %s2210_s0 = inlined_call_operand.vmem [shape: f32[2,8,32], index: 0, kind: input, shape index: {}]   ;;  %s2211_s1 = inlined_call_operand.vmem [shape: bf16[32,96], index: 1, kind: input, shape index: {}]   ;;  %s2212_s2 = inlined_call_operand.vmem [shape: f32[1,96], index: 2, kind: input, shape index: {}]   ;;  %s2213_s3 = inlined_call_operand.vmem [shape: bf16[32,32], index: 3, kind: input, shape index: {}]   ;;  %s2214_s4 = inlined_call_operand.vmem [shape: f32[1,32], index: 4, kind: input, shape index: {}]   ;;  %s2215_s5 = inlined_call_operand.vmem [shape: f32[1,32], index: 5, kind: input, shape index: {}]   ;;  %s2216_s6 = inlined_call_operand.vmem [shape: f32[1,32], index: 6, kind: input, shape index: {}]   ;;  %s2217_s7 = inlined_call_operand.hbm [shape: bf16[32,64], index: 7, kind: input, shape index: {}]   ;;  %s2218_s8 = inlined_call_operand.vmem [shape: f32[1,64], index: 8, kind: input, shape index: {}]   ;;  %s2219_s9 = inlined_call_operand.vmem [shape: bf16[64,32], index: 9, kind: input, shape index: {}]   ;;  %s2220_s10 = inlined_call_operand.vmem [shape: f32[1,32], index: 10, kind: input, shape index: {}]   ;;  %s2221_s11 = inlined_call_operand.vmem [shape: f32[1,32], index: 11, kind: input, shape index: {}]   ;;  %s2222_s12 = inlined_call_operand.vmem [shape: f32[1,32], index: 12, kind: input, shape index: {}]   ;;  %s2223_s13 = inlined_call_operand.hbm [shape: f32[2,8,32], index: 13, kind: output, shape index: {}]  }
   0x1   :  { %2230 = sst [smem:[#allocation11_spill]] %s2210_s0 }
   0x2   :  { %18 = vsyncpa [#allocation3], 0 }
   0x3   :  { %19 = vsyncpa [#allocation4], 0 }
   0x4   :  { %21 = vsyncpa [#allocation4 + $0x1], 0  ;;  %s1946_s25 = smov 0   ;;  %s1948_s26 = smov 0  }
   0x5   :  { %s1950_s27 = smov 0   ;;  %s1952_s28 = smov 0  }
   0x6 LB: > { %2231 = sst [smem:[#allocation8_spill]] %s1864_s27  ;;  %s1967_s29 = sadd.s32 4294967295, %s1868_s28   ;;  %s1868_s28 = sphi %s1952_s28, %s2244_s28   ;;  %s1864_s27 = sphi %s1950_s27, %s2246_s27   ;;  %s1860_s26 = sphi %s1948_s26, %s2248_s26   ;;  %s1856_s25 = sphi %s1946_s25, %s2247_s25  }
   0x7   : > { %s1519_s30 = sadd.s32 4294967294, %s1868_s28   ;;  %s1971_s14 = sadd.s32 1, %s1868_s28  }
   0x8   : > { %2232 = sst [smem:[#allocation9_spill]] %s1971_s14  ;;  %s312_s15 = sadd.s32 1, %s1864_s27 }
   0x9   : > { %s309_s16 = ssub.s32 %s1868_s28, %s1971_s14  ;;  %p322_p0 = scmp.ne.s32.totalorder %s1864_s27, %s1860_s26 }
   0xa   : > { %p310_p1 = scmp.eq.s32.totalorder %s309_s16, 0  ;;  %p323_p2 = scmp.eq.s32.totalorder %s1967_s29, 1 }
   0xb   : > { %p328_p3 = scmp.ne.s32.totalorder %s1860_s26, %s1856_s25  ;;  %p329_p4 = scmp.eq.s32.totalorder %s1519_s30, 1 }
   0xc   : > { %s1982_s17 = scalar_select %p310_p1, %s1864_s27, %s312_s15  }
   0xd   : > { %p1984_p5 = por %p323_p2, %p322_p0  ;;  %p1988_p6 = por %p329_p4, %p328_p3 }
   0xe   : > { %2233 = sst [smem:[#allocation10_spill]] %s1982_s17  ;;  %p1520_p7 = scmp.ge.s32.totalorder %s1868_s28, 1 }
   0xf   : > { %s2234_s18 = scalar_select %p1984_p5, 1, 0 }
  0x10   : > { %s2235_s19 = scalar_select %p1988_p6, 1, 0 }
  0x11   : > { %p336_p8 = scmp.lt.s32.totalorder %s1868_s28, 3  ;;  %p2227_p9 = scmp.eq.s32.totalorder %s1967_s29, 0 }
  0x12   : > { %s1870_s21 = smov [#allocation2]   ;;  %s1774_s15 = scalar_lea.hbm %s2217_s7, 256 }
  0x13   : > { %p1995_p10 = pnand %p1520_p7, %p336_p8  ;;  %s366_s22 = sshll.u32 %s1870_s21, 4  ;;  %s367_s22 = int_to_ptr.vmem [resolvable:$true] %s366_s22 }
  0x14   : > { %p1775_p13 = scmp.ne.s32.totalorder %s2217_s7, %s1774_s15  ;;  %p1781_p3 = scmp.lt.u32.totalorder %s1774_s15, %s2217_s7 }
  0x15   : > { %s2236_s20 = scalar_select %p1995_p10, 1, 0 }
  0x16   : > { %p1695_p11 = pneg %p1995_p10 }
  0x18   : > { %p2003_p12 = pnand %p2227_p9, %p1695_p11 }
  0x1a   : > { %p1776_p0 = pneg %p2003_p12 }
  0x1c   : > { %p1777_p1 = pnand %p1776_p0, %p1775_p13 }
  0x1e   : > { %p1778_p2 = pneg %p1777_p1 }
  0x20   : > { %p1783_p4 = pnand %p1781_p3, %p1778_p2 }
  0x22   : > { %1786 = shalt.err (!%p1783_p4)
}
  0x23   : > { %s1787_s14 = scalar_lea.vmem %s367_s22, 256  ;;  %p1795_p9 = scmp.lt.s32.totalorder %s367_s22, %s367_s22 }
  0x24   : > { %p1788_p7 = scmp.ne.s32.totalorder %s367_s22, %s1787_s14  ;;  %p1796_p6 = scmp.lt.s32.totalorder %s1787_s14, %s1787_s14 }
  0x26   : > { %p1790_p8 = pnand %p1788_p7, %p1776_p0  ;;  %p1797_p5 = por %p1796_p6, %p1795_p9 }
  0x28   : > { %p1791_p11 = pneg %p1790_p8 }
  0x2a   : > { %p1798_p10 = pnand %p1797_p5, %p1791_p11 }
  0x2c   : > { %1801 = shalt.err (!%p1798_p10)
}
  0x2d   : > { %s1871_s17 = smov 64   ;;  %s1872_s24 = smov 4  }
  0x2e   : > { %1698 = dma.hbm_to_vmem [thread:$0]  (!%p2003_p12), %s2217_s7, 256, %s367_s22, [#allocation3], %s1871_s17, %s1871_s17, %s1872_s24  }
  0x2f   : > { %p2238_p13 = scmp.ne.s32.totalorder %s2236_s20, 0 }
  0x30   : > { %p2239_p1 = scmp.eq.s32.totalorder (!%p2238_p13), %s1967_s29, 0 }
  0x31   : > { %404 = sbr.rel (%p2238_p13) target bundleno = 2465 (0x9a1), region = 72 }
  0x38   : > { %1847 = dma.done.wait (%p2239_p1), [#allocation3], 256   ;;  %p2240_p0 = pmov %p2239_p1 }
  0x39   : > { %p447_p5 = scmp.lt.s32.totalorder %s1967_s29, 1  ;;  %v1873_v0 = vmov 0.0   ;;  %vm1874_vm0 = vmmov 0   ;;  %s2241_s0 = sld [smem:[#allocation11_spill]]  ;;  %v1744_v1 = vld [vmem:[%s2211_s1] sm:$0xff]   ;;  %v1745_v2 = vld [vmem:[%s2211_s1 + $0x8] sm:$0xff]  }
  0x3a   : > { %1849 = vsyncadd (%p2240_p0), [#allocation3], 4294967040  ;;  %1605 = vmatprep.subr.bf16.mxu0 %v1873_v0  ;;  %1609 = vmatprep.mubr.msk.bf16.mxu0 %vm1874_vm0, %v1873_v0  ;;  %vm477_vm1 = vcmask 261120   ;;  %v1527_v5 = vld [vmem:[%s2212_s2] ss:$0 sm:$0xff]  ;;  %vm640_vm2 = vcmask 1043456  }
  0x3b   : > { %s448_s27 = scalar_select %p447_p5, %s1967_s29, 1  ;;  %1613 = vmatprep.subr.bf16.mxu1 %v1873_v0  ;;  %1615 = vmatprep.mubr.msk.bf16.mxu1 %vm1874_vm0, %v1873_v0  ;;  %vm636_vm3 = vcmask 64512   ;;  %vm1357_vm4 = vcmask 523264  }
  0x3c   : > { %1606 = vmatpush3.bf16.msra.mxu0 %v1744_v1  ;;  %s1572_s21 = sshll.u32 %s1967_s29, 7  ;;  %p2242_p9 = scmp.ne.s32.totalorder %s2234_s18, 0 }
  0x3d   : > { %s1526_s14 = sshll.u32 %s448_s27, 3  ;;  %1607 = vmatprep.subr.bf16.mxu0 %v1873_v0  ;;  %s444_s27 = sand.u32 1, %s1860_s26  }
  0x3e   : > { %s1435_s20 = scalar_lea.sflag [#allocation4], %s444_s27  ;;  %s1875_s29 = smov [#allocation5]  }
  0x3f   : > { %s450_s23 = scalar_lea.vmem %s2241_s0, %s1526_s14  ;;  %s1525_s14 = sshll.u32 %s444_s27, 3 }
  0x40   : > { %v2046_v3 = vld [vmem:[%s450_s23] sm:$0xff]  ;;  %1608 = vmatpush3.bf16.msra.mxu0 %v1745_v2  ;;  %s446_s17 = scalar_lea.vmem [#allocation5], %s1525_s14  ;;  %s2167_s0 = scalar_lea.hbm %s2223_s13, %s1572_s21 }
  0x41   : > { %v453_v4 = vpack.c.bf16 %v2046_v3, %v2046_v3  ;;  %1637 = vmatprep.subr.bf16.mxu0 %v1873_v0  ;;  %s1448_s24 = sshll.u32 %s446_s17, 4  ;;  %s1806_s14 = sshll.u32 %s1875_s29, 4  ;;  %s2169_s24 = int_to_ptr.vmem [resolvable:$true] %s1448_s24  ;;  %s1807_s14 = int_to_ptr.vmem [resolvable:$false] %s1806_s14 }
  0x42   : > { %s1802_s22 = scalar_lea.vmem %s2169_s24, 128  ;;  %s1808_s23 = scalar_lea.vmem %s1807_s14, 256 }
  0x43   : > { %1610 = vmatmul.mubr.msk.bf16.vlgmr.msra.gmra.mrb[0].mxu0 %vm477_vm1, %v453_v4  ;;  %p1803_p6 = scmp.ne.s32.totalorder %s2169_s24, %s1802_s22  ;;  %p1809_p2 = scmp.lt.s32.totalorder %s2169_s24, %s1807_s14 }
  0x44   : > { %1639 = vmatprep.mubr.msk.bf16.mxu0 %vm1874_vm0, %v1873_v0  ;;  %p1810_p3 = scmp.lt.s32.totalorder %s1808_s23, %s1802_s22 }
  0x45   : > { %p1804_p10 = pnand %p1803_p6, %p2242_p9 }
  0x46   : > { %p1811_p4 = por %p1810_p3, %p1809_p2 }
  0x47   : > { %p1805_p12 = pneg %p1804_p10 }
  0x49   : > { %p1812_p7 = pnand %p1811_p4, %p1805_p12 }
 0x116   : > { %v515_v6 = vpop.f32.mrb[0].mxu0 }
 0x117   : > { %v1611_v7 = vpop.f32.mrb[1].mxu0  ;;  %v516_v8 = vadd.f32 %v1527_v5, %v515_v6 }
 0x118   : > { %v518_v9 = vpop.f32.mrb[2].mxu0 }
 0x119   : > { %v1612_v10 = vpop.f32.mrb[3].mxu0  ;;  %v521_v11 = vpack.c.bf16 %v516_v8, %v516_v8 }
 0x11b   : > { %522 = vxpose.xlu0.c.b16.start.end [1/1] (short) (narrow) %v521_v11, 96 }
 0x181   : > { %v530_v12 = vpop.trf.xlu0 }
 0x182   : > { %v1532_v13 = vcombine.high %v530_v12, %v530_v12  ;;  %v1531_v14 = vcombine.low %v530_v12, %v530_v12 }
 0x184   : > { %588 = vxpose.xlu1.c.b16.start.end [1/1] (short) (narrow) %v1532_v13, 16  ;;  %572 = vxpose.xlu0.c.b16.start.end [1/1] (short) (narrow) %v1531_v14, 16 }
 0x185   : > { %v531_v15 = vpop.trf.xlu0 }
 0x186   : > { %v1533_v16 = vcombine.low %v531_v15, %v531_v15  ;;  %v1534_v17 = vcombine.high %v531_v15, %v531_v15 }
 0x188   : > { %604 = vxpose.xlu1.c.b16.start.end [1/1] (short) (narrow) %v1533_v16, 16 }
 0x189   : > { %v532_v18 = vpop.trf.xlu0 }
 0x18a   : > { %v1535_v19 = vcombine.low %v532_v18, %v532_v18  ;;  %v1536_v20 = vcombine.high %v532_v18, %v532_v18 }
 0x18c   : > { %620 = vxpose.xlu1.c.b16.start.end [1/1] (short) (narrow) %v1534_v17, 16  ;;  %v642_v21 = vsel %vm640_vm2, %v1535_v19, 0  ;;  %v688_v22 = vsel %vm640_vm2, %v1536_v20, 0 }
 0x18d   : > { %1614 = vmatpush3.bf16.msra.mxu1 %v642_v21  ;;  %v533_v23 = vpop.trf.xlu0 }
 0x18e   : > { %v1537_v24 = vcombine.low %v533_v23, %v533_v23  ;;  %v1538_v25 = vcombine.high %v533_v23, %v533_v23  ;;  %1619 = vmatprep.subr.bf16.mxu1 %v1873_v0 }
 0x190   : > { %v734_v26 = vsel %vm640_vm2, %v1537_v24, 0  ;;  %v780_v27 = vsel %vm640_vm2, %v1538_v25, 0 }
 0x191   : > { %v534_v28 = vpop.trf.xlu0 }
 0x192   : > { %v1539_v29 = vcombine.low %v534_v28, %v534_v28  ;;  %v1540_v35 = vcombine.high %v534_v28, %v534_v28 }
 0x194   : > { %v874_v30 = vsel %vm636_vm3, %v1539_v29, 0  ;;  %v920_v37 = vsel %vm636_vm3, %v1540_v35, 0 }
 0x195   : > { %1638 = vmatpush3.bf16.xpose.msra.mxu0 %v874_v30  ;;  %v2061_v31 = vpop.trf.xlu0 }
 0x196   : > { %1649 = vmatprep.subr.bf16.mxu0 %v1873_v0  ;;  %v1541_v19 = vcombine.low %v2061_v31, %v2061_v31  ;;  %v1542_v25 = vcombine.high %v2061_v31, %v2061_v31 }
 0x198   : > { %v966_v23 = vsel %vm636_vm3, %v1541_v19, 0  ;;  %v1012_v28 = vsel %vm636_vm3, %v1542_v25, 0  ;;  %v1557_v25 = vld [vmem:[%s2215_s5] ss:$0 sm:$0xff] }
 0x1ea   : > { %v580_v32 = vpop.trf.xlu0  ;;  %v596_v33 = vpop.trf.xlu1 }
 0x1eb   : > { %1616 = vmatmul.mubr.msk.bf16.vlgmr.msra.gmra.mrb[0].mxu1 %vm636_vm3, %v580_v32 }
 0x1ec   : > { %1620 = vmatpush3.bf16.msra.mxu1 %v688_v22  ;;  %1621 = vmatprep.mubr.msk.bf16.mxu1 %vm1874_vm0, %v1873_v0 }
 0x1ed   : > { %1625 = vmatprep.subr.bf16.mxu1 %v1873_v0 }
 0x1ee   : > { %v612_v34 = vpop.trf.xlu1 }
 0x1f2   : > { %v628_v36 = vpop.trf.xlu1 }
 0x1f3   : > { %1622 = vmatmul.mubr.msk.bf16.vlgmr.msra.gmra.mrb[4].mxu1 %vm636_vm3, %v596_v33 }
 0x1f4   : > { %1626 = vmatpush3.bf16.msra.mxu1 %v734_v26  ;;  %1627 = vmatprep.mubr.msk.bf16.mxu1 %vm1874_vm0, %v1873_v0 }
 0x1f5   : > { %1631 = vmatprep.subr.bf16.mxu1 %v1873_v0 }
 0x1fb   : > { %1628 = vmatmul.mubr.msk.bf16.vlgmr.msra.gmra.mrb[8].mxu1 %vm636_vm3, %v612_v34 }
 0x1fc   : > { %1632 = vmatpush3.bf16.msra.mxu1 %v780_v27  ;;  %1633 = vmatprep.mubr.msk.bf16.mxu1 %vm1874_vm0, %v1873_v0 }
 0x1fd   : > { %1643 = vmatprep.subr.bf16.mxu1 %v1873_v0 }
 0x203   : > { %1634 = vmatmul.mubr.msk.bf16.vlgmr.msra.gmra.mrb[12].mxu1 %vm636_vm3, %v628_v36 }
 0x204   : > { %1645 = vmatprep.mubr.msk.bf16.mxu1 %vm1874_vm0, %v1873_v0 }
 0x205   : > { %1644 = vmatpush3.bf16.xpose.msra.mxu1 %v920_v37 }
 0x206   : > { %1655 = vmatprep.subr.bf16.mxu1 %v1873_v0 }
 0x2be   : > { %v678_v38 = vpop.f32.mrb[0].mxu1 }
 0x2bf   : > { %v1617_v39 = vpop.f32.mrb[1].mxu1  ;;  %v822_v40 = vsel %vm636_vm3, %v678_v38, -inf }
 0x2c0   : > { %823 = vmax.xlane.f32.xlu1 %v822_v40  ;;  %v681_v41 = vpop.f32.mrb[2].mxu1 }
 0x2c1   : > { %v1618_v42 = vpop.f32.mrb[3].mxu1  ;;  %v1746_v41 = vld [vmem:[%s2213_s3] sm:$0xff]  }
 0x2c2   : > { %v1747_v42 = vld [vmem:[%s2213_s3 + $0x8] sm:$0xff]  }
 0x2c6   : > { %v724_v43 = vpop.f32.mrb[4].mxu1 }
 0x2c7   : > { %v1623_v44 = vpop.f32.mrb[5].mxu1  ;;  %v825_v45 = vsel %vm636_vm3, %v724_v43, -inf }
 0x2c8   : > { %826 = vmax.xlane.f32.xlu0 %v825_v45  ;;  %v727_v46 = vpop.f32.mrb[6].mxu1 }
 0x2c9   : > { %v1624_v47 = vpop.f32.mrb[7].mxu1 }
 0x2ce   : > { %v770_v48 = vpop.f32.mrb[8].mxu1 }
 0x2cf   : > { %v1629_v49 = vpop.f32.mrb[9].mxu1  ;;  %v828_v50 = vsel %vm636_vm3, %v770_v48, -inf }
 0x2d0   : > { %829 = vmax.xlane.f32.xlu1 %v828_v50  ;;  %v773_v51 = vpop.f32.mrb[10].mxu1 }
 0x2d1   : > { %v1630_v52 = vpop.f32.mrb[11].mxu1 }
 0x2d6   : > { %v816_v53 = vpop.f32.mrb[12].mxu1 }
 0x2d7   : > { %v1635_v54 = vpop.f32.mrb[13].mxu1  ;;  %v831_v55 = vsel %vm636_vm3, %v816_v53, -inf }
 0x2d8   : > { %832 = vmax.xlane.f32.xlu1 %v831_v55  ;;  %v819_v56 = vpop.f32.mrb[14].mxu1 }
 0x2d9   : > { %v1636_v57 = vpop.f32.mrb[15].mxu1 }
 0x34d   : > { %v824_v58 = vpop.xlane.xlu1 %823 }
 0x34e   : > { %v834_v59 = vsub.f32 %v678_v38, %v824_v58 }
 0x350   : > { %v838_v60 = vmul.f32 1.442695, %v834_v59 }
 0x352   : > { %1754 = vpow2.f32 %v838_v60 }
 0x355   : > { %v827_v61 = vpop.xlane.xlu0 %826 }
 0x356   : > { %v835_v62 = vsub.f32 %v724_v43, %v827_v61 }
 0x358   : > { %v840_v63 = vmul.f32 1.442695, %v835_v62 }
 0x35a   : > { %1756 = vpow2.f32 %v840_v63 }
 0x35c   : > { %v1755_v1 = vpop.eup %1754 }
 0x35d   : > { %v830_v2 = vpop.xlane.xlu1 %829  ;;  %v846_v4 = vsel %vm636_vm3, %v1755_v1, 0.0 }
 0x35e   : > { %v836_v5 = vsub.f32 %v770_v48, %v830_v2  ;;  %847 = vadd.xlane.f32.xlu1 %v846_v4  ;;  %v1553_v2 = vld [vmem:[%s2214_s4] ss:$0 sm:$0xff] }
 0x360   : > { %v842_v6 = vmul.f32 1.442695, %v836_v5 }
 0x362   : > { %1758 = vpow2.f32 %v842_v6 }
 0x364   : > { %v1757_v7 = vpop.eup %1756 }
 0x365   : > { %v833_v8 = vpop.xlane.xlu1 %832  ;;  %v849_v9 = vsel %vm636_vm3, %v1757_v7, 0.0 }
 0x366   : > { %v837_v10 = vsub.f32 %v816_v53, %v833_v8  ;;  %850 = vadd.xlane.f32.xlu1 %v849_v9 }
 0x368   : > { %v844_v11 = vmul.f32 1.442695, %v837_v10 }
 0x36a   : > { %1760 = vpow2.f32 %v844_v11 }
 0x36c   : > { %v1759_v12 = vpop.eup %1758 }
 0x36d   : > { %v852_v13 = vsel %vm636_vm3, %v1759_v12, 0.0 }
 0x36e   : > { %853 = vadd.xlane.f32.xlu0 %v852_v13  ;;  %v1748_v13 = vld [vmem:[#allocation2] sm:$0xff]  }
 0x374   : > { %v1761_v14 = vpop.eup %1760 }
 0x375   : > { %v855_v15 = vsel %vm636_vm3, %v1761_v14, 0.0 }
 0x376   : > { %856 = vadd.xlane.f32.xlu1 %v855_v15  ;;  %v1750_v15 = vld [vmem:[%s2219_s9] sm:$0xff]  }
 0x3eb   : > { %v848_v16 = vpop.xlane.xlu1 %847 }
 0x3ec   : > { %1762 = vrcp.f32 %v848_v16 }
 0x3f3   : > { %v851_v17 = vpop.xlane.xlu1 %850 }
 0x3f4   : > { %1764 = vrcp.f32 %v851_v17 }
 0x3f6   : > { %v1763_v18 = vpop.eup %1762 }
 0x3f7   : > { %v862_v20 = vmul.f32 %v1763_v18, %v1755_v1 }
 0x3f9   : > { %v866_v21 = vpack.c.bf16 %v862_v20, %v862_v20 }
 0x3fb   : > { %v854_v22 = vpop.xlane.xlu0 %853  ;;  %1640 = vmatmul.mubr.msk.bf16.vlgmr.msra.gmra.mrb[4].mxu0 %vm636_vm3, %v866_v21 }
 0x3fc   : > { %1766 = vrcp.f32 %v854_v22  ;;  %1650 = vmatpush3.bf16.xpose.msra.mxu0 %v966_v23  ;;  %1651 = vmatprep.mubr.msk.bf16.mxu0 %vm1874_vm0, %v1873_v0 }
 0x3fd   : > { %1661 = vmatprep.subr.bf16.mxu0 %v1873_v0 }
 0x3fe   : > { %v1765_v24 = vpop.eup %1764 }
 0x3ff   : > { %v863_v26 = vmul.f32 %v1765_v24, %v1757_v7 }
 0x401   : > { %v867_v27 = vpack.c.bf16 %v863_v26, %v863_v26 }
 0x403   : > { %1646 = vmatmul.mubr.msk.bf16.vlgmr.msra.gmra.mrb[16].mxu1 %vm636_vm3, %v867_v27  ;;  %v857_v29 = vpop.xlane.xlu1 %856  ;;  %v1558_v27 = vld [vmem:[%s2216_s6] ss:$0 sm:$0xff] }
 0x404   : > { %1656 = vmatpush3.bf16.xpose.msra.mxu1 %v1012_v28  ;;  %1768 = vrcp.f32 %v857_v29  ;;  %1657 = vmatprep.mubr.msk.bf16.mxu1 %vm1874_vm0, %v1873_v0 }
 0x405   : > { %1669 = vmatprep.subr.bf16.mxu1 %v1873_v0 }
 0x406   : > { %v1767_v30 = vpop.eup %1766 }
 0x407   : > { %v864_v32 = vmul.f32 %v1767_v30, %v1759_v12 }
 0x409   : > { %v868_v33 = vpack.c.bf16 %v864_v32, %v864_v32  ;;  %v1752_v32 = vld [vmem:[%s2219_s9 + $0x10] sm:$0xff]  }
 0x40b   : > { %1652 = vmatmul.mubr.msk.bf16.vlgmr.msra.gmra.mrb[8].mxu0 %vm636_vm3, %v868_v33  ;;  %v1753_v33 = vld [vmem:[%s2219_s9 + $0x18] sm:$0xff]  }
 0x40c   : > { %1665 = vmatprep.mubr.msk.bf16.mxu0 %vm1874_vm0, %v1873_v0  ;;  %1662 = vmatpush3.bf16.msra.mxu0 %v1746_v41 }
 0x40d   : > { %1663 = vmatprep.subr.bf16.mxu0 %v1873_v0 }
 0x40e   : > { %v1769_v31 = vpop.eup %1768 }
 0x40f   : > { %v865_v34 = vmul.f32 %v1769_v31, %v1761_v14  ;;  %v1749_v14 = vld [vmem:[#allocation2 + $0x8] sm:$0xff]   ;;  %v1559_v31 = vld [vmem:[%s2218_s8] ss:$0 sm:$0xff] }
 0x410   : > { %1664 = vmatpush3.bf16.msra.mxu0 %v1747_v42 }
 0x411   : > { %v869_v35 = vpack.c.bf16 %v865_v34, %v865_v34  ;;  %1677 = vmatprep.subr.bf16.mxu0 %v1873_v0 }
 0x413   : > { %1658 = vmatmul.mubr.msk.bf16.vlgmr.msra.gmra.mrb[20].mxu1 %vm636_vm3, %v869_v35 }
 0x414   : > { %1673 = vmatprep.mubr.msk.bf16.mxu1 %vm1874_vm0, %v1873_v0  ;;  %1670 = vmatpush3.bf16.msra.mxu1 %v1748_v13 }
 0x415   : > { %1671 = vmatprep.subr.bf16.mxu1 %v1873_v0 }
 0x418   : > { %1672 = vmatpush3.bf16.msra.mxu1 %v1749_v14 }
 0x4ce   : > { %v910_v36 = vpop.f32.mrb[4].mxu0 }
 0x4cf   : > { %v1054_v37 = vpack.c.bf16 %v910_v36, %v910_v36  ;;  %v1641_v38 = vpop.f32.mrb[5].mxu0 }
 0x4d0   : > { %v913_v39 = vpop.f32.mrb[6].mxu0 }
 0x4d1   : > { %1058 = vxpose.xlu0.c.b16.start.end [1/1] (short) (narrow) %v1054_v37, 16  ;;  %v1642_v40 = vpop.f32.mrb[7].mxu0 }
 0x4d6   : > { %v956_v43 = vpop.f32.mrb[16].mxu1 }
 0x4d7   : > { %v1055_v44 = vpack.c.bf16 %v956_v43, %v956_v43  ;;  %v1647_v45 = vpop.f32.mrb[17].mxu1 }
 0x4d8   : > { %v959_v46 = vpop.f32.mrb[18].mxu1 }
 0x4d9   : > { %1074 = vxpose.xlu1.c.b16.start.end [1/1] (short) (narrow) %v1055_v44, 16  ;;  %v1648_v47 = vpop.f32.mrb[19].mxu1 }
 0x4de   : > { %v1002_v48 = vpop.f32.mrb[8].mxu0 }
 0x4df   : > { %v1056_v49 = vpack.c.bf16 %v1002_v48, %v1002_v48  ;;  %v1653_v50 = vpop.f32.mrb[9].mxu0 }
 0x4e0   : > { %v1005_v51 = vpop.f32.mrb[10].mxu0 }
 0x4e1   : > { %1090 = vxpose.xlu0.c.b16.start.end [1/1] (short) (narrow) %v1056_v49, 16  ;;  %v1654_v52 = vpop.f32.mrb[11].mxu0 }
 0x4e6   : > { %v1048_v53 = vpop.f32.mrb[20].mxu1 }
 0x4e7   : > { %v1057_v54 = vpack.c.bf16 %v1048_v53, %v1048_v53  ;;  %v1659_v55 = vpop.f32.mrb[21].mxu1 }
 0x4e8   : > { %v1051_v56 = vpop.f32.mrb[22].mxu1 }
 0x4e9   : > { %1106 = vxpose.xlu1.c.b16.start.end [1/1] (short) (narrow) %v1057_v54, 16  ;;  %v1660_v57 = vpop.f32.mrb[23].mxu1 }
 0x537   : > { %v1066_v58 = vpop.trf.xlu0 }
 0x53f   : > { %v1082_v59 = vpop.trf.xlu1 }
 0x540   : > { %v1551_v60 = vcombine.low %v1066_v58, %v1082_v59  ;;  %v1569_v59 = vld [vmem:[%s2221_s11] ss:$0 sm:$0xff] }
 0x542   : > { %1134 = vxpose.xlu0.c.b16.start [1/2] (short) (narrow) %v1551_v60, 16 }
 0x547   : > { %v1098_v61 = vpop.trf.xlu0 }
 0x54f   : > { %v1114_v62 = vpop.trf.xlu1 }
 0x550   : > { %v1552_v63 = vcombine.low %v1098_v61, %v1114_v62  ;;  %v1570_v61 = vld [vmem:[%s2222_s12] ss:$0 sm:$0xff] }
 0x552   : > { %1135 = vxpose.xlu0.c.b16.end [2/2] (short) (narrow) %v1552_v63, 16 }
 0x5b4   : > { %v1142_v1 = vpop.trf.xlu0 }
 0x5b5   : > { %1666 = vmatmul.mubr.msk.bf16.vlgmr.msra.gmra.mrb[12].mxu0 %vm477_vm1, %v1142_v1 }
 0x5b6   : > { %1685 = vmatprep.mubr.msk.bf16.mxu0 %vm1874_vm0, %v1873_v0  ;;  %1678 = vmatpush3.bf16.msra.mxu0 %v1750_v15 }
 0x5b7   : > { %1679 = vmatprep.subr.bf16.mxu0 %v1873_v0 }
 0x688   : > { %v1210_v4 = vpop.f32.mrb[12].mxu0 }
 0x689   : > { %v1211_v5 = vadd.f32 %v1553_v2, %v1210_v4  ;;  %v1667_v6 = vpop.f32.mrb[13].mxu0 }
 0x68a   : > { %v1213_v7 = vpop.f32.mrb[14].mxu0 }
 0x68b   : > { %v1216_v8 = vadd.f32 %v1211_v5, %v2046_v3  ;;  %v1668_v9 = vpop.f32.mrb[15].mxu0  ;;  %v1751_v3 = vld [vmem:[%s2219_s9 + $0x8] sm:$0xff]  }
 0x68c   : > { %1680 = vmatpush3.bf16.msra.mxu0 %v1751_v3 }
 0x68d   : > { %v1219_v10 = vsel %vm477_vm1, %v1216_v8, 0.0  ;;  %v1224_v11 = vmul.f32 %v1216_v8, %v1216_v8  ;;  %1681 = vmatprep.subr.bf16.mxu0 %v1873_v0 }
 0x68e   : > { %1220 = vadd.xlane.f32.xlu1 %v1219_v10 }
 0x68f   : > { %v1225_v12 = vsel %vm477_vm1, %v1224_v11, 0.0 }
 0x690   : > { %1226 = vadd.xlane.f32.xlu0 %v1225_v12  ;;  %1682 = vmatpush3.bf16.msra.mxu0 %v1752_v32 }
 0x691   : > { %1683 = vmatprep.subr.bf16.mxu0 %v1873_v0  ;;  %v1563_v0 = vld [vmem:[%s2220_s10] ss:$0 sm:$0xff] }
 0x694   : > { %1684 = vmatpush3.bf16.msra.mxu0 %v1753_v33 }
 0x71b   : > { %v1221_v16 = vpop.xlane.xlu1 %1220 }
 0x71c   : > { %v1223_v17 = vmul.f32 0.03125, %v1221_v16 }
 0x71d   : > { %v1227_v18 = vpop.xlane.xlu0 %1226 }
 0x71e   : > { %v1229_v19 = vmul.f32 %v1223_v17, %v1223_v17  ;;  %v1228_v20 = vmul.f32 0.03125, %v1227_v18  ;;  %v1231_v23 = vsub.f32 %v1216_v8, %v1223_v17 }
 0x720   : > { %v1230_v21 = vsub.f32 %v1228_v20, %v1229_v19 }
 0x722   : > { %v1232_v22 = vadd.f32 1e-05, %v1230_v21 }
 0x724   : > { %1770 = vrsqrt.f32 %v1232_v22 }
 0x72e   : > { %v1771_v24 = vpop.eup %1770 }
 0x72f   : > { %v1234_v26 = vmul.f32 %v1771_v24, %v1231_v23 }
 0x731   : > { %v1241_v28 = vmul.f32 %v1557_v25, %v1234_v26 }
 0x733   : > { %v1248_v29 = vadd.f32 %v1558_v27, %v1241_v28 }
 0x735   : > { %v1249_v30 = vpack.c.bf16 %v1248_v29, %v1248_v29 }
 0x737   : > { %1674 = vmatmul.mubr.msk.bf16.vlgmr.msra.gmra.mrb[24].mxu1 %vm477_vm1, %v1249_v30 }
 0x80a   : > { %v1310_v34 = vpop.f32.mrb[24].mxu1 }
 0x80b   : > { %v1311_v35 = vadd.f32 %v1559_v31, %v1310_v34  ;;  %v1675_v36 = vpop.f32.mrb[25].mxu1 }
 0x80c   : > { %v1313_v37 = vpop.f32.mrb[26].mxu1 }
 0x80d   : > { %v1316_v38 = vmax.f32 %v1311_v35, 0.0  ;;  %v1676_v39 = vpop.f32.mrb[27].mxu1 }
 0x80f   : > { %v1317_v40 = vpack.c.bf16 %v1316_v38, %v1316_v38 }
 0x811   : > { %1686 = vmatmul.mubr.msk.bf16.vlgmr.msra.gmra.mrb[16].mxu0 %vm1357_vm4, %v1317_v40 }
 0x8e4   : > { %v1395_v41 = vpop.f32.mrb[16].mxu0 }
 0x8e5   : > { %v1396_v42 = vadd.f32 %v1563_v0, %v1395_v41  ;;  %v1687_v43 = vpop.f32.mrb[17].mxu0 }
 0x8e6   : > { %v1398_v44 = vpop.f32.mrb[18].mxu0 }
 0x8e7   : > { %v1401_v45 = vadd.f32 %v1396_v42, %v1248_v29  ;;  %v1688_v46 = vpop.f32.mrb[19].mxu0 }
 0x8e9   : > { %v1404_v47 = vsel %vm477_vm1, %v1401_v45, 0.0  ;;  %v1408_v48 = vmul.f32 %v1401_v45, %v1401_v45 }
 0x8ea   : > { %1405 = vadd.xlane.f32.xlu1 %v1404_v47 }
 0x8eb   : > { %v1409_v49 = vsel %vm477_vm1, %v1408_v48, 0.0 }
 0x8ee   : > { %1410 = vadd.xlane.f32.xlu1 %v1409_v49 }
 0x977   : > { %v1406_v50 = vpop.xlane.xlu1 %1405 }
 0x978   : > { %v1407_v51 = vmul.f32 0.03125, %v1406_v50 }
 0x97a   : > { %v1413_v53 = vmul.f32 %v1407_v51, %v1407_v51  ;;  %v1415_v57 = vsub.f32 %v1401_v45, %v1407_v51 }
 0x97b   : > { %v1411_v52 = vpop.xlane.xlu1 %1410 }
 0x97c   : > { %v1412_v54 = vmul.f32 0.03125, %v1411_v52 }
 0x97e   : > { %v1414_v55 = vsub.f32 %v1412_v54, %v1413_v53 }
 0x980   : > { %v1416_v56 = vadd.f32 1e-05, %v1414_v55 }
 0x982   : > { %1772 = vrsqrt.f32 %v1416_v56 }
 0x98c   : > { %v1773_v58 = vpop.eup %1772 }
 0x98d   : > { %v1418_v60 = vmul.f32 %v1773_v58, %v1415_v57 }
 0x98f   : > { %v1425_v62 = vmul.f32 %v1569_v59, %v1418_v60 }
 0x991   : > { %v1432_v63 = vadd.f32 %v1570_v61, %v1425_v62 }
 0x993   : > { %1433 = vst.msk [vmem:[%s446_s17] sm:$0xff] %vm477_vm1, %v1432_v63 }
 0x994   : > { %1815 = shalt.err (!%p1812_p7)
}
 0x995   : > { %s1816_s27 = scalar_lea.hbm %s2167_s0, 128  ;;  %s1820_s17 = scalar_lea.hbm %s2223_s13, 256 }
 0x996   : > { %p1817_p8 = scmp.ne.s32.totalorder %s2167_s0, %s1816_s27  ;;  %p1821_p1 = scmp.lt.u32.totalorder %s2167_s0, %s2223_s13 }
 0x997   : > { %p1822_p0 = scmp.lt.u32.totalorder %s1820_s17, %s1816_s27  ;;  %p1824_p6 = scmp.lt.u32.totalorder %s1816_s27, %s2167_s0 }
 0x998   : > { %p1818_p11 = pnand %p1817_p8, %p2242_p9 }
 0x999   : > { %p1823_p5 = por %p1822_p0, %p1821_p1 }
 0x99a   : > { %p1819_p13 = pneg %p1818_p11 }
 0x99b   : > { %p1825_p10 = por %p1824_p6, %p1823_p5 }
 0x99d   : > { %p1826_p12 = pnand %p1825_p10, %p1819_p13 }
 0x99f   : > { %1829 = shalt.err (!%p1826_p12)
}
 0x9a0   : > { %1693 = dma.vmem_to_hbm [thread:$0]  (%p2242_p9), %s2169_s24, 128, %s2167_s0, %s1435_s20  }
 0x9a1 PF: > { %p1705_p2 = scmp.ge.s32.totalorder %s1868_s28, 2  ;;  %s1460_s22 = sand.u32 1, %s1856_s25  }
 0x9a2   : > { %p2243_p3 = scmp.ne.s32.totalorder %s2235_s19, 0  ;;  %s1461_s29 = scalar_lea.sflag [#allocation4], %s1460_s22 }
 0x9a4   : > { %p1700_p4 = pnand %p1705_p2, %p2243_p3 }
 0x9a6   : > { %1851 = dma.done.wait (!%p1700_p4), %s1461_s29, 128  }
 0x9a7   : > { %1853 = vsyncadd (!%p1700_p4), %s1461_s29, 4294967168  ;;  %s2244_s28 = sld [smem:[#allocation9_spill]]  ;;  %s2245_s14 = sld [smem:[#allocation8_spill]] }
 0x9a8   : > { %s2246_s27 = sld [smem:[#allocation10_spill]]  ;;  %s2247_s25 = smov %s1860_s26 }
 0x9ad   : > { %p24_p7 = scmp.ge.s32.totalorder %s2244_s28, 4   ;;  %s2248_s26 = smov %s2245_s14 }
 0x9af   :  { %26 = sbr.rel (!%p24_p7) target bundleno = 6 (0x6), region = 112 }
 0x9b6   :  { %1466 = vsyncpa [#allocation3], 1 }
 0x9b7   :  { %1468 = vsyncpa [#allocation3 + $0x1], 1 }
 0x9b8   :  { %1469 = vsyncpa [#allocation4], 1 }
 0x9b9   :  { %1471 = vsyncpa [#allocation4 + $0x1], 1 }

</bundles_post_ra>
